<compile_context>
chip_gen: v6e
topology: v6e:2x2x1
jax: 0.10.0
libtpu: 0.0.40
codegen_flags: <defaults>
</compile_context>

<pallas_src>
import math

import jax
import jax.numpy as jnp
from jax.experimental import pallas as pl
from jax.experimental.pallas import tpu as pltpu

HIDDEN = 256
_LANE = 128
_TB_MAX = 2048   # per-step batch-tile cap (v7x has the smallest scoped VMEM)


def _round_up(n, m):
    return ((n + m - 1) // m) * m


def _num_tensorcores_per_chip():
    """2 on v7x (grid steps shard across its TensorCores), else 1."""
    try:
        kind = jax.devices()[0].device_kind.lower()
    except Exception:
        return 1
    return 2 if ("v7" in kind or "tpu7" in kind) else 1


def _pick_tb(batch, n_cores):
    # v5e/v6e: one big step (pure loop overhead otherwise).  v7x: two balanced
    # steps so both TensorCores get work.  Lane-multiple, VMEM-capped.
    tb = _round_up(max(1, math.ceil(batch / max(1, n_cores))), _LANE)
    return max(_LANE, min(tb, _TB_MAX))


def _soft_q_kernel(xa_ref, w1_ref, b1_ref, w2_ref, b2_ref, w3_ref, b3_ref,
                   out_ref):
    # Feature-major compute: activations are [features, tb].
    # fc1 + relu: single merged K=(obs+act) MXU pass, bf16 in / f32 accumulate.
    h1 = jnp.dot(w1_ref[...], xa_ref[...].astype(jnp.bfloat16),
                 preferred_element_type=jnp.float32)
    h1 = jnp.maximum(h1 + b1_ref[...], 0.0)

    # fc2 + relu.
    h2 = jnp.dot(w2_ref[...], h1.astype(jnp.bfloat16),
                 preferred_element_type=jnp.float32)
    h2 = jnp.maximum(h2 + b2_ref[...], 0.0)

    # fc3 (output width 1): VPU multiply + sublane reduction -> lane-dense
    # [1, tb] row (unmasked stores, no MXU pass wasted); scalar bias from SMEM.
    q = jnp.sum(h2 * w3_ref[...], axis=0, keepdims=True) + b3_ref[0, 0]
    out_ref[...] = q.astype(out_ref.dtype)


def _pallas_forward(xa_t, params, *, tb, grid, single_buffer_weights):
    w1, b1, w2, b2, w3, b3 = params
    in_dim, b_pad = xa_t.shape
    hidden = w2.shape[0]

    mode = pl.Buffered(1) if single_buffer_weights else None

    def resident(shape):
        # Constant index_map -> never re-fetched across grid steps; request a
        # single buffer when supported (saves VMEM / bookkeeping).
        if mode is None:
            return pl.BlockSpec(shape, lambda i: (0,) * len(shape))
        return pl.BlockSpec(shape, lambda i: (0,) * len(shape),
                            pipeline_mode=mode)

    flops = 2 * b_pad * (in_dim * hidden + hidden * hidden + hidden)
    bytes_accessed = (
        (w1.size + w2.size) * 2                        # bf16 weights
        + (b1.size + b2.size + w3.size + b3.size) * 4  # f32 biases / fc3 col
        + xa_t.size * xa_t.dtype.itemsize              # activations in
        + b_pad * 4                                    # Q out
    )

    return pl.pallas_call(
        _soft_q_kernel,
        out_shape=jax.ShapeDtypeStruct((1, b_pad), jnp.float32),
        grid=grid,
        in_specs=[
            pl.BlockSpec((in_dim, tb), lambda i: (0, i)),       # obs||act tile
            resident((hidden, in_dim)),                         # w1 [256, in]
            resident((hidden, 1)),                              # b1 [256, 1]
            resident((hidden, hidden)),                         # w2 [256, 256]
            resident((hidden, 1)),                              # b2 [256, 1]
            resident((hidden, 1)),                              # w3 [256, 1]
            pl.BlockSpec(memory_space=pltpu.MemorySpace.SMEM),  # b3 scalar
        ],
        out_specs=pl.BlockSpec((1, tb), lambda i: (0, i)),      # lane-dense Q
        compiler_params=pltpu.CompilerParams(
            dimension_semantics=("parallel",),
            vmem_limit_bytes=32 * 1024 * 1024),
        cost_estimate=pl.CostEstimate(
            flops=flops, transcendentals=0, bytes_accessed=bytes_accessed),
    )(xa_t, w1, b1, w2, b2, w3, b3)


def soft_q_forward(x, a, params, *, tb=None):
    """x: [B, obs_dim], a: [B, act_dim] (f32 or bf16) -> Q-values [B, 1] f32."""
    B = x.shape[0]
    if tb is None:
        tb = _pick_tb(B, _num_tensorcores_per_chip())
    else:
        tb = max(_LANE, min(_round_up(tb, _LANE), _TB_MAX))
    b_pad = _round_up(B, tb)
    grid = (b_pad // tb,)

    # Fold the concat into one packed activation buffer and go feature-major:
    # [obs+act, b_pad].  Tiny copy (B x (obs+act) elements), fused by XLA.
    xa = jnp.concatenate([x, a], axis=1)
    if b_pad != B:
        xa = jnp.pad(xa, ((0, b_pad - B), (0, 0)))
    xa_t = xa.T

    try:
        out = _pallas_forward(xa_t, params, tb=tb, grid=grid,
                              single_buffer_weights=True)
    except Exception:
        # pipeline_mode=pl.Buffered(1) unsupported on this JAX build: fall back
        # to default double-buffered resident weights (still correct/resident).
        out = _pallas_forward(xa_t, params, tb=tb, grid=grid,
                              single_buffer_weights=False)
    return out[0, :B].reshape(B, 1)


def init_params(key, obs_dim, act_dim, hidden=HIDDEN):
    """nn.Linear-style U(-1/sqrt(fan_in), 1/sqrt(fan_in)) init.

    Weights are stored in PyTorch's native [out_features, in_features] layout
    (the kernel computes feature-major).  MXU weights are bf16; biases and the
    fc3 column stay f32; the fc3 bias is a (1, 1) SMEM scalar.
    """
    def linear(k, fan_in, fan_out):
        kw, kb = jax.random.split(k)
        bound = 1.0 / math.sqrt(fan_in)
        w = jax.random.uniform(kw, (fan_out, fan_in), jnp.float32, -bound, bound)
        b = jax.random.uniform(kb, (fan_out, 1), jnp.float32, -bound, bound)
        return w, b

    k1, k2, k3 = jax.random.split(key, 3)
    w1, b1 = linear(k1, obs_dim + act_dim, hidden)
    w2, b2 = linear(k2, hidden, hidden)
    w3, b3 = linear(k3, hidden, 1)
    return (w1.astype(jnp.bfloat16), b1,
            w2.astype(jnp.bfloat16), b2,
            w3.reshape(hidden, 1),           # fc3 weight as f32 column (VPU)
            b3.reshape(1, 1))


def reference_forward_bf16(x, a, params):
    """Plain-JAX mirror of the kernel's bf16-in / f32-accumulate compute."""
    w1, b1, w2, b2, w3, b3 = params
    xa_t = jnp.concatenate([x, a], axis=1).astype(jnp.bfloat16).T
    h1 = jnp.maximum(
        jnp.dot(w1, xa_t, preferred_element_type=jnp.float32) + b1, 0.0)
    h2 = jnp.maximum(
        jnp.dot(w2, h1.astype(jnp.bfloat16),
                preferred_element_type=jnp.float32) + b2, 0.0)
    q = jnp.sum(h2 * w3, axis=0, keepdims=True) + b3[0, 0]
    return q.T


def reference_forward_f32(x, a, params):
    """Full-precision reference matching the original PyTorch module."""
    w1, b1, w2, b2, w3, b3 = params
    h = jnp.concatenate([x, a], axis=1)
    h = jnp.maximum(h @ w1.astype(jnp.float32).T + b1[:, 0], 0.0)
    h = jnp.maximum(h @ w2.astype(jnp.float32).T + b2[:, 0], 0.0)
    return h @ w3 + b3[0, 0]


if __name__ == "__main__":
    key = jax.random.PRNGKey(0)
    kx, ka, kp = jax.random.split(key, 3)

    # Small synthetic SAC-like shapes: obs_dim=24, act_dim=8, batch=8.
    B, OBS, ACT = 8, 24, 8
    x = jax.random.normal(kx, (B, OBS), jnp.float32)
    a = jax.random.normal(ka, (B, ACT), jnp.float32)
    params = init_params(kp, OBS, ACT)

    q = soft_q_forward(x, a, params)
    jax.block_until_ready(q)
    assert q.shape == (B, 1)

    q_bf16_ref = reference_forward_bf16(x, a, params)
    q_f32_ref = reference_forward_f32(x, a, params)
    assert jnp.allclose(q, q_bf16_ref, atol=2e-3, rtol=2e-3), "mismatch vs bf16 reference"
    assert jnp.allclose(q, q_f32_ref, atol=3e-2, rtol=3e-2), "mismatch vs f32 reference"

    # Second shape exercises the multi-step batch grid (padding + lane tiling).
    B2 = 300
    kx2, ka2 = jax.random.split(jax.random.PRNGKey(1))
    x2 = jax.random.normal(kx2, (B2, OBS), jnp.float32)
    a2 = jax.random.normal(ka2, (B2, ACT), jnp.float32)
    q2 = soft_q_forward(x2, a2, params, tb=128)
    jax.block_until_ready(q2)
    assert q2.shape == (B2, 1)
    assert jnp.allclose(q2, reference_forward_bf16(x2, a2, params),
                        atol=2e-3, rtol=2e-3), "mismatch vs bf16 reference (tiled)"

    print("KERNEL_OK")
</pallas_src>

<mosaic_0001>
module attributes {stable_mosaic.version = 11 : i64} {
  func.func @_soft_q_kernel(%arg0: i32, %arg1: memref<32x128xf32, #tpu.memory_space<vmem>>, %arg2: memref<256x32xbf16, #tpu.memory_space<vmem>>, %arg3: memref<256x1xf32, #tpu.memory_space<vmem>>, %arg4: memref<256x256xbf16, #tpu.memory_space<vmem>>, %arg5: memref<256x1xf32, #tpu.memory_space<vmem>>, %arg6: memref<256x1xf32, #tpu.memory_space<vmem>>, %arg7: memref<1x1xf32, #tpu.memory_space<smem>>, %arg8: memref<1x128xf32, #tpu.memory_space<vmem>>) attributes {dimension_semantics = [#tpu.dimension_semantics<parallel>], iteration_bounds = array<i64: 1>, scalar_prefetch = 0 : i64, scratch_operands = 0 : i64, tpu.core_type = #tpu.core_type<tc>, window_params = [{transform_indices = @transform_0, window_bounds = array<i64: 32, 128>}, {pipeline_mode = #tpu.pipeline_mode<synchronous>, transform_indices = @transform_1, window_bounds = array<i64: 256, 32>}, {pipeline_mode = #tpu.pipeline_mode<synchronous>, transform_indices = @transform_2, window_bounds = array<i64: 256, 1>}, {pipeline_mode = #tpu.pipeline_mode<synchronous>, transform_indices = @transform_3, window_bounds = array<i64: 256, 256>}, {pipeline_mode = #tpu.pipeline_mode<synchronous>, transform_indices = @transform_4, window_bounds = array<i64: 256, 1>}, {pipeline_mode = #tpu.pipeline_mode<synchronous>, transform_indices = @transform_5, window_bounds = array<i64: 256, 1>}, {transform_indices = @transform_6, window_bounds = array<i64: 1, 1>}, {transform_indices = @transform_7, window_bounds = array<i64: 1, 128>}]} {
    %c0 = arith.constant 0 : index
    %c0_0 = arith.constant 0 : index
    %0 = vector.load %arg2[%c0, %c0_0] : memref<256x32xbf16, #tpu.memory_space<vmem>>, vector<256x32xbf16>
    %c0_1 = arith.constant 0 : index
    %c0_2 = arith.constant 0 : index
    %1 = vector.load %arg1[%c0_1, %c0_2] : memref<32x128xf32, #tpu.memory_space<vmem>>, vector<32x128xf32>
    %2 = arith.truncf %1 : vector<32x128xf32> to vector<32x128xbf16>
    %cst = arith.constant dense<0.000000e+00> : vector<256x128xf32>
    %3 = tpu.matmul %0, %2, %cst {dimension_numbers = #tpu.dot_dimension_numbers<[1], [0], [0], [1], [0, 0, 1, 1], [], []>} : vector<256x32xbf16>, vector<32x128xbf16>, vector<256x128xf32> -> vector<256x128xf32>
    %c0_3 = arith.constant 0 : index
    %c0_4 = arith.constant 0 : index
    %4 = vector.load %arg3[%c0_3, %c0_4] : memref<256x1xf32, #tpu.memory_space<vmem>>, vector<256x1xf32>
    %5 = vector.broadcast %4 : vector<256x1xf32> to vector<256x128xf32>
    %6 = arith.addf %3, %5 : vector<256x128xf32>
    %cst_5 = arith.constant 0.000000e+00 : f32
    %7 = vector.broadcast %cst_5 : f32 to vector<256x128xf32>
    %8 = arith.maximumf %6, %7 : vector<256x128xf32>
    %c0_6 = arith.constant 0 : index
    %c0_7 = arith.constant 0 : index
    %9 = vector.load %arg4[%c0_6, %c0_7] : memref<256x256xbf16, #tpu.memory_space<vmem>>, vector<256x256xbf16>
    %10 = arith.truncf %8 : vector<256x128xf32> to vector<256x128xbf16>
    %cst_8 = arith.constant dense<0.000000e+00> : vector<256x128xf32>
    %11 = tpu.matmul %9, %10, %cst_8 {dimension_numbers = #tpu.dot_dimension_numbers<[1], [0], [0], [1], [0, 0, 1, 1], [], []>} : vector<256x256xbf16>, vector<256x128xbf16>, vector<256x128xf32> -> vector<256x128xf32>
    %c0_9 = arith.constant 0 : index
    %c0_10 = arith.constant 0 : index
    %12 = vector.load %arg5[%c0_9, %c0_10] : memref<256x1xf32, #tpu.memory_space<vmem>>, vector<256x1xf32>
    %13 = vector.broadcast %12 : vector<256x1xf32> to vector<256x128xf32>
    %14 = arith.addf %11, %13 : vector<256x128xf32>
    %cst_11 = arith.constant 0.000000e+00 : f32
    %15 = vector.broadcast %cst_11 : f32 to vector<256x128xf32>
    %16 = arith.maximumf %14, %15 : vector<256x128xf32>
    %c0_12 = arith.constant 0 : index
    %c0_13 = arith.constant 0 : index
    %17 = vector.load %arg6[%c0_12, %c0_13] : memref<256x1xf32, #tpu.memory_space<vmem>>, vector<256x1xf32>
    %18 = vector.broadcast %17 : vector<256x1xf32> to vector<256x128xf32>
    %19 = arith.mulf %16, %18 : vector<256x128xf32>
    %cst_14 = arith.constant dense<0.000000e+00> : vector<128xf32>
    %20 = vector.multi_reduction <add>, %19, %cst_14 [0] : vector<256x128xf32> to vector<128xf32>
    %21 = vector.shape_cast %20 : vector<128xf32> to vector<1x128xf32>
    %c0_15 = arith.constant 0 : index
    %c0_16 = arith.constant 0 : index
    %22 = memref.load %arg7[%c0_15, %c0_16] : memref<1x1xf32, #tpu.memory_space<smem>>
    %23 = vector.broadcast %22 : f32 to vector<1x128xf32>
    %24 = arith.addf %21, %23 : vector<1x128xf32>
    %c0_17 = arith.constant 0 : index
    %c0_18 = arith.constant 0 : index
    %25 = vector.load %arg8[%c0_17, %c0_18] : memref<1x128xf32, #tpu.memory_space<vmem>>, vector<1x128xf32>
    tpu.vector_store %arg8[%c0_17, %c0_18], %24 {strides = array<i32>} : memref<1x128xf32, #tpu.memory_space<vmem>>, vector<1x128xf32>,
    return
  }
  func.func @transform_0(%arg0: i32) -> (i32, i32) {
    %c0_i32 = arith.constant 0 : i32
    %c0_i32_0 = arith.constant 0 : i32
    return %c0_i32, %arg0 : i32, i32
  }
  func.func @transform_1(%arg0: i32) -> (i32, i32) {
    %c0_i32 = arith.constant 0 : i32
    %c0_i32_0 = arith.constant 0 : i32
    %c0_i32_1 = arith.constant 0 : i32
    return %c0_i32, %c0_i32_0 : i32, i32
  }
  func.func @transform_2(%arg0: i32) -> (i32, i32) {
    %c0_i32 = arith.constant 0 : i32
    %c0_i32_0 = arith.constant 0 : i32
    %c0_i32_1 = arith.constant 0 : i32
    return %c0_i32, %c0_i32_0 : i32, i32
  }
  func.func @transform_3(%arg0: i32) -> (i32, i32) {
    %c0_i32 = arith.constant 0 : i32
    %c0_i32_0 = arith.constant 0 : i32
    %c0_i32_1 = arith.constant 0 : i32
    return %c0_i32, %c0_i32_0 : i32, i32
  }
  func.func @transform_4(%arg0: i32) -> (i32, i32) {
    %c0_i32 = arith.constant 0 : i32
    %c0_i32_0 = arith.constant 0 : i32
    %c0_i32_1 = arith.constant 0 : i32
    return %c0_i32, %c0_i32_0 : i32, i32
  }
  func.func @transform_5(%arg0: i32) -> (i32, i32) {
    %c0_i32 = arith.constant 0 : i32
    %c0_i32_0 = arith.constant 0 : i32
    %c0_i32_1 = arith.constant 0 : i32
    return %c0_i32, %c0_i32_0 : i32, i32
  }
  func.func @transform_6(%arg0: i32) -> (i32, i32) {
    %c0_i32 = arith.constant 0 : i32
    %c0_i32_0 = arith.constant 0 : i32
    %c0_i32_1 = arith.constant 0 : i32
    return %c0_i32, %c0_i32_0 : i32, i32
  }
  func.func @transform_7(%arg0: i32) -> (i32, i32) {
    %c0_i32 = arith.constant 0 : i32
    %c0_i32_0 = arith.constant 0 : i32
    return %c0_i32, %arg0 : i32, i32
  }
}

module attributes {stable_mosaic.version = 11 : i64} {
  func.func @_soft_q_kernel(%arg0: i32, %arg1: memref<32x128xf32, #tpu.memory_space<vmem>>, %arg2: memref<256x32xbf16, #tpu.memory_space<vmem>>, %arg3: memref<256x1xf32, #tpu.memory_space<vmem>>, %arg4: memref<256x256xbf16, #tpu.memory_space<vmem>>, %arg5: memref<256x1xf32, #tpu.memory_space<vmem>>, %arg6: memref<256x1xf32, #tpu.memory_space<vmem>>, %arg7: memref<1x1xf32, #tpu.memory_space<smem>>, %arg8: memref<1x128xf32, #tpu.memory_space<vmem>>) attributes {dimension_semantics = [#tpu.dimension_semantics<parallel>], iteration_bounds = array<i64: 1>, scalar_prefetch = 0 : i64, scratch_operands = 0 : i64, tpu.core_type = #tpu.core_type<tc>, window_params = [{transform_indices = @transform_0, window_bounds = array<i64: 32, 128>}, {pipeline_mode = #tpu.pipeline_mode<synchronous>, transform_indices = @transform_1, window_bounds = array<i64: 256, 32>}, {pipeline_mode = #tpu.pipeline_mode<synchronous>, transform_indices = @transform_2, window_bounds = array<i64: 256, 1>}, {pipeline_mode = #tpu.pipeline_mode<synchronous>, transform_indices = @transform_3, window_bounds = array<i64: 256, 256>}, {pipeline_mode = #tpu.pipeline_mode<synchronous>, transform_indices = @transform_4, window_bounds = array<i64: 256, 1>}, {pipeline_mode = #tpu.pipeline_mode<synchronous>, transform_indices = @transform_5, window_bounds = array<i64: 256, 1>}, {transform_indices = @transform_6, window_bounds = array<i64: 1, 1>}, {transform_indices = @transform_7, window_bounds = array<i64: 1, 128>}]} {
    %c0 = arith.constant 0 : index
    %c0_0 = arith.constant 0 : index
    %0 = vector.load %arg2[%c0, %c0_0] : memref<256x32xbf16, #tpu.memory_space<vmem>>, vector<256x32xbf16>
    %c0_1 = arith.constant 0 : index
    %c0_2 = arith.constant 0 : index
    %1 = vector.load %arg1[%c0_1, %c0_2] : memref<32x128xf32, #tpu.memory_space<vmem>>, vector<32x128xf32>
    %2 = arith.truncf %1 : vector<32x128xf32> to vector<32x128xbf16>
    %cst = arith.constant dense<0.000000e+00> : vector<256x128xf32>
    %3 = tpu.matmul %0, %2, %cst {dimension_numbers = #tpu.dot_dimension_numbers<[1], [0], [0], [1], [0, 0, 1, 1], [], []>} : vector<256x32xbf16>, vector<32x128xbf16>, vector<256x128xf32> -> vector<256x128xf32>
    %c0_3 = arith.constant 0 : index
    %c0_4 = arith.constant 0 : index
    %4 = vector.load %arg3[%c0_3, %c0_4] : memref<256x1xf32, #tpu.memory_space<vmem>>, vector<256x1xf32>
    %5 = vector.broadcast %4 : vector<256x1xf32> to vector<256x128xf32>
    %6 = arith.addf %3, %5 : vector<256x128xf32>
    %cst_5 = arith.constant 0.000000e+00 : f32
    %7 = vector.broadcast %cst_5 : f32 to vector<256x128xf32>
    %8 = arith.maximumf %6, %7 : vector<256x128xf32>
    %c0_6 = arith.constant 0 : index
    %c0_7 = arith.constant 0 : index
    %9 = vector.load %arg4[%c0_6, %c0_7] : memref<256x256xbf16, #tpu.memory_space<vmem>>, vector<256x256xbf16>
    %10 = arith.truncf %8 : vector<256x128xf32> to vector<256x128xbf16>
    %cst_8 = arith.constant dense<0.000000e+00> : vector<256x128xf32>
    %11 = tpu.matmul %9, %10, %cst_8 {dimension_numbers = #tpu.dot_dimension_numbers<[1], [0], [0], [1], [0, 0, 1, 1], [], []>} : vector<256x256xbf16>, vector<256x128xbf16>, vector<256x128xf32> -> vector<256x128xf32>
    %c0_9 = arith.constant 0 : index
    %c0_10 = arith.constant 0 : index
    %12 = vector.load %arg5[%c0_9, %c0_10] : memref<256x1xf32, #tpu.memory_space<vmem>>, vector<256x1xf32>
    %13 = vector.broadcast %12 : vector<256x1xf32> to vector<256x128xf32>
    %14 = arith.addf %11, %13 : vector<256x128xf32>
    %cst_11 = arith.constant 0.000000e+00 : f32
    %15 = vector.broadcast %cst_11 : f32 to vector<256x128xf32>
    %16 = arith.maximumf %14, %15 : vector<256x128xf32>
    %c0_12 = arith.constant 0 : index
    %c0_13 = arith.constant 0 : index
    %17 = vector.load %arg6[%c0_12, %c0_13] : memref<256x1xf32, #tpu.memory_space<vmem>>, vector<256x1xf32>
    %18 = vector.broadcast %17 : vector<256x1xf32> to vector<256x128xf32>
    %19 = arith.mulf %16, %18 : vector<256x128xf32>
    %cst_14 = arith.constant dense<0.000000e+00> : vector<128xf32>
    %20 = vector.multi_reduction <add>, %19, %cst_14 [0] : vector<256x128xf32> to vector<128xf32>
    %21 = vector.shape_cast %20 : vector<128xf32> to vector<1x128xf32>
    %c0_15 = arith.constant 0 : index
    %c0_16 = arith.constant 0 : index
    %22 = memref.load %arg7[%c0_15, %c0_16] : memref<1x1xf32, #tpu.memory_space<smem>>
    %23 = vector.broadcast %22 : f32 to vector<1x128xf32>
    %24 = arith.addf %21, %23 : vector<1x128xf32>
    %c0_17 = arith.constant 0 : index
    %c0_18 = arith.constant 0 : index
    %25 = vector.load %arg8[%c0_17, %c0_18] : memref<1x128xf32, #tpu.memory_space<vmem>>, vector<1x128xf32>
    tpu.vector_store %arg8[%c0_17, %c0_18], %24 {strides = array<i32>} : memref<1x128xf32, #tpu.memory_space<vmem>>, vector<1x128xf32>,
    return
  }
  func.func @transform_0(%arg0: i32) -> (i32, i32) {
    %c0_i32 = arith.constant 0 : i32
    %c0_i32_0 = arith.constant 0 : i32
    return %c0_i32, %arg0 : i32, i32
  }
  func.func @transform_1(%arg0: i32) -> (i32, i32) {
    %c0_i32 = arith.constant 0 : i32
    %c0_i32_0 = arith.constant 0 : i32
    %c0_i32_1 = arith.constant 0 : i32
    return %c0_i32, %c0_i32_0 : i32, i32
  }
  func.func @transform_2(%arg0: i32) -> (i32, i32) {
    %c0_i32 = arith.constant 0 : i32
    %c0_i32_0 = arith.constant 0 : i32
    %c0_i32_1 = arith.constant 0 : i32
    return %c0_i32, %c0_i32_0 : i32, i32
  }
  func.func @transform_3(%arg0: i32) -> (i32, i32) {
    %c0_i32 = arith.constant 0 : i32
    %c0_i32_0 = arith.constant 0 : i32
    %c0_i32_1 = arith.constant 0 : i32
    return %c0_i32, %c0_i32_0 : i32, i32
  }
  func.func @transform_4(%arg0: i32) -> (i32, i32) {
    %c0_i32 = arith.constant 0 : i32
    %c0_i32_0 = arith.constant 0 : i32
    %c0_i32_1 = arith.constant 0 : i32
    return %c0_i32, %c0_i32_0 : i32, i32
  }
  func.func @transform_5(%arg0: i32) -> (i32, i32) {
    %c0_i32 = arith.constant 0 : i32
    %c0_i32_0 = arith.constant 0 : i32
    %c0_i32_1 = arith.constant 0 : i32
    return %c0_i32, %c0_i32_0 : i32, i32
  }
  func.func @transform_6(%arg0: i32) -> (i32, i32) {
    %c0_i32 = arith.constant 0 : i32
    %c0_i32_0 = arith.constant 0 : i32
    %c0_i32_1 = arith.constant 0 : i32
    return %c0_i32, %c0_i32_0 : i32, i32
  }
  func.func @transform_7(%arg0: i32) -> (i32, i32) {
    %c0_i32 = arith.constant 0 : i32
    %c0_i32_0 = arith.constant 0 : i32
    return %c0_i32, %arg0 : i32, i32
  }
}

</mosaic_0001>

<bundles_post_ra>
// kernel: tpu_custom_call.1
= control target key start
LH: loop header
LB: loop body
LE: loop exit
PB: predicated region body
PF: predicated region fallthrough
CT: control target
= control target key end

     0   :  { %v1789_v3 = vmov 0   ;;  %vm339_vm0 = vcmask 261120   ;;  %s2586_s0 = inlined_call_operand.vmem [shape: f32[32,128], index: 0, kind: input, shape index: {}]   ;;  %s2587_s1 = inlined_call_operand.vmem [shape: bf16[256,32], index: 1, kind: input, shape index: {}]   ;;  %s2588_s2 = inlined_call_operand.vmem [shape: f32[256,1], index: 2, kind: input, shape index: {}]   ;;  %s2589_s3 = inlined_call_operand.vmem [shape: bf16[256,256], index: 3, kind: input, shape index: {}]   ;;  %s2590_s4 = inlined_call_operand.vmem [shape: f32[256,1], index: 4, kind: input, shape index: {}]   ;;  %s2591_s5 = inlined_call_operand.vmem [shape: f32[256,1], index: 5, kind: input, shape index: {}]   ;;  %s2592_s6 = inlined_call_operand.<no memory space> [shape: f32[1,1], index: 6, kind: input, shape index: {}]   ;;  %s2593_s7 = inlined_call_operand.hbm [shape: f32[1,128], index: 7, kind: output, shape index: {}]  }
   0x1   :  { %v97_v0 = vld [vmem:[%s2588_s2 + $0xf0] sm:$0xff]  ;;  %1702 = vset.pattern.permute.xlu1 %v1789_v3  ;;  %1701 = vset.pattern.permute.xlu0 %v1789_v3  ;;  %v64_v4 = vld [vmem:[%s2586_s0 + $0x18] sm:$0xff]  ;;  %v61_v7 = vld [vmem:[%s2586_s0] sm:$0xff] }
   0x2   :  { %v81_v1 = vld [vmem:[%s2588_s2 + $0x70] sm:$0xff]  ;;  %251 = vperm.xlu0 %1701, %v97_v0   ;;  %v98_v6 = vld [vmem:[%s2588_s2 + $0xf8] sm:$0xff]  ;;  %v62_v8 = vld [vmem:[%s2586_s0 + $0x8] sm:$0xff] }
   0x3   :  { %v63_v2 = vld [vmem:[%s2586_s0 + $0x10] sm:$0xff]  ;;  %171 = vperm.xlu1 %1702, %v81_v1   ;;  %v82_v9 = vld [vmem:[%s2588_s2 + $0x78] sm:$0xff]  ;;  %v65_v10 = vpack.c.bf16 %v62_v8, %v61_v7  ;;  %v1703_v11 = vld [vmem:[%s2587_s1] sm:$0xff]  }
   0x4   :  { %v66_v5 = vpack.c.bf16 %v64_v4, %v63_v2  ;;  %v95_v12 = vld [vmem:[%s2588_s2 + $0xe0] sm:$0xff]  ;;  %v96_v13 = vld [vmem:[%s2588_s2 + $0xe8] sm:$0xff]  ;;  %1651 = vmatprep.mubr.msk.bf16.mxu0 %vm339_vm0, %v1703_v11  ;;  %v1705_v15 = vld [vmem:[%s2587_s1 + $0x10] sm:$0xff]  }
   0x5   :  { %v1704_v14 = vld [vmem:[%s2587_s1 + $0x8] sm:$0xff]   ;;  %v79_v17 = vld [vmem:[%s2588_s2 + $0x60] sm:$0xff]  ;;  %v94_v18 = vld [vmem:[%s2588_s2 + $0xd8] sm:$0xff] }
   0x6   :  { %1647 = vmatprep.subr.bf16.mxu0 %v66_v5  ;;  %256 = vperm.xlu0 %1701, %v98_v6   ;;  %v80_v16 = vld [vmem:[%s2588_s2 + $0x68] sm:$0xff]  ;;  %v93_v19 = vld [vmem:[%s2588_s2 + $0xd0] sm:$0xff]  ;;  %v1706_v20 = vld [vmem:[%s2587_s1 + $0x18] sm:$0xff]  }
   0x7   :  { %1648 = vmatpush3.bf16.msra.mxu0 %v66_v5  ;;  %176 = vperm.xlu1 %1702, %v82_v9   ;;  %v1707_v21 = vld [vmem:[%s2587_s1 + $0x20] sm:$0xff]   ;;  %v78_v22 = vld [vmem:[%s2588_s2 + $0x58] sm:$0xff]  ;;  %v77_v23 = vld [vmem:[%s2588_s2 + $0x50] sm:$0xff] }
   0x8   :  { %1649 = vmatprep.subr.bf16.mxu0 %v65_v10  ;;  %v92_v24 = vld [vmem:[%s2588_s2 + $0xc8] sm:$0xff]  ;;  %v91_v25 = vld [vmem:[%s2588_s2 + $0xc0] sm:$0xff]  ;;  %v1709_v27 = vld [vmem:[%s2587_s1 + $0x30] sm:$0xff]  }
   0x9   :  { %v1708_v26 = vld [vmem:[%s2587_s1 + $0x28] sm:$0xff]   ;;  %v75_v29 = vld [vmem:[%s2588_s2 + $0x40] sm:$0xff]  ;;  %v90_v30 = vld [vmem:[%s2588_s2 + $0xb8] sm:$0xff] }
   0xa   :  { %241 = vperm.xlu0 %1701, %v95_v12   ;;  %v76_v28 = vld [vmem:[%s2588_s2 + $0x48] sm:$0xff]  ;;  %v89_v31 = vld [vmem:[%s2588_s2 + $0xb0] sm:$0xff]  ;;  %v1710_v32 = vld [vmem:[%s2587_s1 + $0x38] sm:$0xff]  }
   0xb   :  { %1650 = vmatpush3.bf16.msra.mxu0 %v65_v10  ;;  %246 = vperm.xlu1 %1702, %v96_v13   ;;  %v1711_v33 = vld [vmem:[%s2587_s1 + $0x40] sm:$0xff]   ;;  %v74_v34 = vld [vmem:[%s2588_s2 + $0x38] sm:$0xff]  ;;  %v73_v35 = vld [vmem:[%s2588_s2 + $0x30] sm:$0xff] }
   0xc   :  { %v88_v36 = vld [vmem:[%s2588_s2 + $0xa8] sm:$0xff]  ;;  %v87_v37 = vld [vmem:[%s2588_s2 + $0xa0] sm:$0xff]  ;;  %v1713_v39 = vld [vmem:[%s2587_s1 + $0x50] sm:$0xff]  }
   0xd   :  { %v1712_v38 = vld [vmem:[%s2587_s1 + $0x48] sm:$0xff]   ;;  %v71_v41 = vld [vmem:[%s2588_s2 + $0x20] sm:$0xff]  ;;  %v86_v42 = vld [vmem:[%s2588_s2 + $0x98] sm:$0xff] }
   0xe   :  { %1652 = vmatmul.mubr.msk.bf16.vlgmr.msra.gmra.mxu0 %vm339_vm0, %v1704_v14  ;;  %161 = vperm.xlu0 %1701, %v79_v17   ;;  %v72_v40 = vld [vmem:[%s2588_s2 + $0x28] sm:$0xff]  ;;  %v85_v43 = vld [vmem:[%s2588_s2 + $0x90] sm:$0xff]  ;;  %v1714_v44 = vld [vmem:[%s2587_s1 + $0x58] sm:$0xff]  }
   0xf   :  { %1655 = vmatprep.mubr.msk.bf16.mxu0 %vm339_vm0, %v1705_v15  ;;  %166 = vperm.xlu1 %1702, %v80_v16   ;;  %v70_v45 = vld [vmem:[%s2588_s2 + $0x18] sm:$0xff]  ;;  %v1715_v46 = vld [vmem:[%s2587_s1 + $0x60] sm:$0xff]   ;;  %v69_v47 = vld [vmem:[%s2588_s2 + $0x10] sm:$0xff] }
  0x10   :  { %v84_v48 = vld [vmem:[%s2588_s2 + $0x88] sm:$0xff]  ;;  %v83_v49 = vld [vmem:[%s2588_s2 + $0x80] sm:$0xff]  ;;  %v1717_v51 = vld [vmem:[%s2587_s1 + $0x70] sm:$0xff]  }
  0x11   :  { %v1716_v50 = vld [vmem:[%s2587_s1 + $0x68] sm:$0xff]   ;;  %v67_v53 = vld [vmem:[%s2588_s2] sm:$0xff] }
  0x12   :  { %231 = vperm.xlu0 %1701, %v93_v19   ;;  %v68_v52 = vld [vmem:[%s2588_s2 + $0x8] sm:$0xff] }
  0x13   :  { %236 = vperm.xlu1 %1702, %v94_v18  }
  0x16   :  { %1656 = vmatmul.mubr.msk.bf16.gmra.mxu0 %vm339_vm0, %v1706_v20  ;;  %151 = vperm.xlu0 %1701, %v77_v23  }
  0x17   :  { %1659 = vmatprep.mubr.msk.bf16.mxu0 %vm339_vm0, %v1707_v21  ;;  %156 = vperm.xlu1 %1702, %v78_v22  }
  0x1a   :  { %221 = vperm.xlu0 %1701, %v91_v25  }
  0x1b   :  { %226 = vperm.xlu1 %1702, %v92_v24  }
  0x1e   :  { %1660 = vmatmul.mubr.msk.bf16.gmra.mxu0 %vm339_vm0, %v1708_v26  ;;  %141 = vperm.xlu0 %1701, %v75_v29  }
  0x1f   :  { %1663 = vmatprep.mubr.msk.bf16.mxu0 %vm339_vm0, %v1709_v27  ;;  %146 = vperm.xlu1 %1702, %v76_v28  }
  0x22   :  { %211 = vperm.xlu0 %1701, %v89_v31  }
  0x23   :  { %216 = vperm.xlu1 %1702, %v90_v30  }
  0x26   :  { %1664 = vmatmul.mubr.msk.bf16.gmra.mxu0 %vm339_vm0, %v1710_v32  ;;  %131 = vperm.xlu0 %1701, %v73_v35  }
  0x27   :  { %1667 = vmatprep.mubr.msk.bf16.mxu0 %vm339_vm0, %v1711_v33  ;;  %136 = vperm.xlu1 %1702, %v74_v34  }
  0x2a   :  { %201 = vperm.xlu0 %1701, %v87_v37  }
  0x2b   :  { %206 = vperm.xlu1 %1702, %v88_v36  }
  0x2e   :  { %1668 = vmatmul.mubr.msk.bf16.gmra.mxu0 %vm339_vm0, %v1712_v38  ;;  %121 = vperm.xlu0 %1701, %v71_v41  }
  0x2f   :  { %1671 = vmatprep.mubr.msk.bf16.mxu0 %vm339_vm0, %v1713_v39  ;;  %126 = vperm.xlu1 %1702, %v72_v40  }
  0x32   :  { %191 = vperm.xlu0 %1701, %v85_v43  }
  0x33   :  { %196 = vperm.xlu1 %1702, %v86_v42  }
  0x36   :  { %1672 = vmatmul.mubr.msk.bf16.gmra.mxu0 %vm339_vm0, %v1714_v44  ;;  %111 = vperm.xlu0 %1701, %v69_v47  }
  0x37   :  { %1675 = vmatprep.mubr.msk.bf16.mxu0 %vm339_vm0, %v1715_v46  ;;  %116 = vperm.xlu1 %1702, %v70_v45  }
  0x3a   :  { %181 = vperm.xlu0 %1701, %v83_v49  }
  0x3b   :  { %186 = vperm.xlu1 %1702, %v84_v48  }
  0x3c   :  { %13 = vsyncpa [#allocation4], 0  ;;  %v630_v54 = vld [vmem:[%s2590_s4 + $0x8] sm:$0xff]  ;;  %v629_v55 = vld [vmem:[%s2590_s4] sm:$0xff]  ;;  %s1790_s13 = smov [#allocation3]  }
  0x3d   :  { %v1718_v56 = vld [vmem:[%s2587_s1 + $0x78] sm:$0xff]   ;;  %v631_v58 = vld [vmem:[%s2590_s4 + $0x10] sm:$0xff]  ;;  %v634_v59 = vld [vmem:[%s2590_s4 + $0x28] sm:$0xff]  ;;  %s1445_s14 = sshll.u32 %s1790_s13, 4  ;;  %s1446_s14 = int_to_ptr.vmem [resolvable:$true] %s1445_s14 }
  0x3e   :  { %1676 = vmatmul.mubr.msk.bf16.gmra.mxu0 %vm339_vm0, %v1716_v50  ;;  %101 = vperm.xlu0 %1701, %v67_v53   ;;  %v632_v57 = vld [vmem:[%s2590_s4 + $0x18] sm:$0xff]  ;;  %v633_v60 = vld [vmem:[%s2590_s4 + $0x20] sm:$0xff]  ;;  %v635_v62 = vld [vmem:[%s2590_s4 + $0x30] sm:$0xff]  ;;  %s1767_s15 = scalar_lea.vmem %s1446_s14, 16  ;;  %s1771_s16 = scalar_lea.vmem %s1446_s14, 32 }
  0x3f   :  { %1679 = vmatprep.mubr.msk.bf16.mxu0 %vm339_vm0, %v1717_v51  ;;  %106 = vperm.xlu1 %1702, %v68_v52   ;;  %v636_v61 = vld [vmem:[%s2590_s4 + $0x38] sm:$0xff]  ;;  %v638_v63 = vld [vmem:[%s2590_s4 + $0x48] sm:$0xff]  ;;  %v637_v0 = vld [vmem:[%s2590_s4 + $0x40] sm:$0xff]  ;;  %p1768_p0 = scmp.ne.s32.totalorder %s1446_s14, %s1767_s15  ;;  %p1772_p1 = scmp.lt.s32.totalorder %s1446_s14, %s1446_s14 }
  0x40   :  { %v640_v1 = vld [vmem:[%s2590_s4 + $0x58] sm:$0xff]  ;;  %v639_v2 = vld [vmem:[%s2590_s4 + $0x50] sm:$0xff]  ;;  %v642_v3 = vld [vmem:[%s2590_s4 + $0x68] sm:$0xff]  ;;  %p1773_p2 = scmp.lt.s32.totalorder %s1771_s16, %s1767_s15 }
  0x41   :  { %v641_v4 = vld [vmem:[%s2590_s4 + $0x60] sm:$0xff]  ;;  %v644_v5 = vld [vmem:[%s2590_s4 + $0x78] sm:$0xff]  ;;  %v643_v6 = vld [vmem:[%s2590_s4 + $0x70] sm:$0xff] }
  0x42   :  { %663 = vperm.xlu0 %1701, %v629_v55   ;;  %v646_v7 = vld [vmem:[%s2590_s4 + $0x88] sm:$0xff]  ;;  %v645_v8 = vld [vmem:[%s2590_s4 + $0x80] sm:$0xff]  ;;  %v648_v9 = vld [vmem:[%s2590_s4 + $0x98] sm:$0xff]  ;;  %p1774_p3 = por %p1773_p2, %p1772_p1 }
  0x43   :  { %668 = vperm.xlu1 %1702, %v630_v54   ;;  %v647_v10 = vld [vmem:[%s2590_s4 + $0x90] sm:$0xff]  ;;  %v650_v11 = vld [vmem:[%s2590_s4 + $0xa8] sm:$0xff]  ;;  %v649_v12 = vld [vmem:[%s2590_s4 + $0xa0] sm:$0xff] }
  0x44   :  { %v652_v13 = vld [vmem:[%s2590_s4 + $0xb8] sm:$0xff]  ;;  %v651_v14 = vld [vmem:[%s2590_s4 + $0xb0] sm:$0xff]  ;;  %v654_v15 = vld [vmem:[%s2590_s4 + $0xc8] sm:$0xff]  ;;  %p1775_p4 = pnand %p1774_p3, %p1768_p0 }
  0x45   :  { %v653_v16 = vld [vmem:[%s2590_s4 + $0xc0] sm:$0xff]  ;;  %v656_v17 = vld [vmem:[%s2590_s4 + $0xd8] sm:$0xff]  ;;  %v655_v18 = vld [vmem:[%s2590_s4 + $0xd0] sm:$0xff] }
  0x46   :  { %1680 = vmatmul.mubr.msk.bf16.gmra.mxu0 %vm339_vm0, %v1718_v56  ;;  %673 = vperm.xlu0 %1701, %v631_v58   ;;  %v1174_v19 = vld [vmem:[%s2591_s5] sm:$0xff]  ;;  %v1176_v21 = vld [vmem:[%s2591_s5 + $0x10] sm:$0xff]  ;;  %v1175_v22 = vld [vmem:[%s2591_s5 + $0x8] sm:$0xff] }
  0x47   :  { %678 = vperm.xlu1 %1702, %v632_v57   ;;  %v657_v20 = vld [vmem:[%s2590_s4 + $0xe0] sm:$0xff]  ;;  %v1177_v26 = vld [vmem:[%s2591_s5 + $0x18] sm:$0xff]  ;;  %v1180_v29 = vld [vmem:[%s2591_s5 + $0x30] sm:$0xff] }
  0x48   :  { %v1178_v25 = vld [vmem:[%s2591_s5 + $0x20] sm:$0xff]  ;;  %v1179_v30 = vld [vmem:[%s2591_s5 + $0x28] sm:$0xff]  ;;  %v1181_v34 = vld [vmem:[%s2591_s5 + $0x38] sm:$0xff] }
  0x49   :  { %v1182_v33 = vld [vmem:[%s2591_s5 + $0x40] sm:$0xff]  ;;  %v1184_v37 = vld [vmem:[%s2591_s5 + $0x50] sm:$0xff]  ;;  %v1183_v38 = vld [vmem:[%s2591_s5 + $0x48] sm:$0xff] }
  0x4a   :  { %683 = vperm.xlu0 %1701, %v633_v60   ;;  %v1186_v40 = vld [vmem:[%s2591_s5 + $0x60] sm:$0xff]  ;;  %v1185_v41 = vld [vmem:[%s2591_s5 + $0x58] sm:$0xff]  ;;  %v1188_v43 = vld [vmem:[%s2591_s5 + $0x70] sm:$0xff] }
  0x4b   :  { %688 = vperm.xlu1 %1702, %v634_v59   ;;  %v1187_v44 = vld [vmem:[%s2591_s5 + $0x68] sm:$0xff]  ;;  %v1190_v47 = vld [vmem:[%s2591_s5 + $0x80] sm:$0xff]  ;;  %v1189_v48 = vld [vmem:[%s2591_s5 + $0x78] sm:$0xff] }
  0x4c   :  { %v1192_v50 = vld [vmem:[%s2591_s5 + $0x90] sm:$0xff]  ;;  %v1191_v51 = vld [vmem:[%s2591_s5 + $0x88] sm:$0xff]  ;;  %v1194_v53 = vld [vmem:[%s2591_s5 + $0xa0] sm:$0xff] }
  0x4d   :  { %v1193_v54 = vld [vmem:[%s2591_s5 + $0x98] sm:$0xff]  ;;  %v1196_v57 = vld [vmem:[%s2591_s5 + $0xb0] sm:$0xff]  ;;  %v1195_v58 = vld [vmem:[%s2591_s5 + $0xa8] sm:$0xff] }
  0x4e   :  { %693 = vperm.xlu0 %1701, %v635_v62   ;;  %v1198_v60 = vld [vmem:[%s2591_s5 + $0xc0] sm:$0xff] }
  0x4f   :  { %698 = vperm.xlu1 %1702, %v636_v61   ;;  %v1197_v61 = vld [vmem:[%s2591_s5 + $0xb8] sm:$0xff] }
  0x52   :  { %703 = vperm.xlu0 %1701, %v637_v0   ;;  %v1199_v0 = vld [vmem:[%s2591_s5 + $0xc8] sm:$0xff] }
  0x53   :  { %708 = vperm.xlu1 %1702, %v638_v63   ;;  %v1200_v63 = vld [vmem:[%s2591_s5 + $0xd0] sm:$0xff] }
  0x56   :  { %713 = vperm.xlu0 %1701, %v639_v2   ;;  %v1721_v2 = vld [vmem:[%s2589_s3 + $0x54] ss:$8 sps:$4 sm:$0xff]  }
  0x57   :  { %718 = vperm.xlu1 %1702, %v640_v1   ;;  %1053 = vmatprep.mubr.bf16.mxu1 %v1721_v2 }
  0x5a   :  { %723 = vperm.xlu0 %1701, %v641_v4  }
  0x5b   :  { %728 = vperm.xlu1 %1702, %v642_v3   ;;  %v1724_v3 = vld [vmem:[%s2589_s3 + $0x4] ss:$8 sps:$4 sm:$0xff]  }
  0x5c   :  { %1013 = vmatprep.mubr.bf16.mxu0 %v1724_v3 }
  0x5e   :  { %733 = vperm.xlu0 %1701, %v643_v6   ;;  %v658_v6 = vld [vmem:[%s2590_s4 + $0xe8] sm:$0xff] }
  0x5f   :  { %738 = vperm.xlu1 %1702, %v644_v5   ;;  %v1201_v5 = vld [vmem:[%s2591_s5 + $0xd8] sm:$0xff] }
  0x62   :  { %743 = vperm.xlu0 %1701, %v645_v8   ;;  %v1202_v8 = vld [vmem:[%s2591_s5 + $0xe0] sm:$0xff] }
  0x63   :  { %748 = vperm.xlu1 %1702, %v646_v7  }
  0x66   :  { %753 = vperm.xlu0 %1701, %v647_v10  }
  0x67   :  { %758 = vperm.xlu1 %1702, %v648_v9   ;;  %v659_v9 = vld [vmem:[%s2590_s4 + $0xf0] sm:$0xff] }
  0x6a   :  { %763 = vperm.xlu0 %1701, %v649_v12   ;;  %v660_v12 = vld [vmem:[%s2590_s4 + $0xf8] sm:$0xff] }
  0x6b   :  { %768 = vperm.xlu1 %1702, %v650_v11   ;;  %v1203_v11 = vld [vmem:[%s2591_s5 + $0xe8] sm:$0xff] }
  0x6e   :  { %773 = vperm.xlu0 %1701, %v651_v14  }
  0x6f   :  { %778 = vperm.xlu1 %1702, %v652_v13  }
  0x72   :  { %783 = vperm.xlu0 %1701, %v653_v16   ;;  %v1204_v16 = vld [vmem:[%s2591_s5 + $0xf0] sm:$0xff] }
  0x73   :  { %788 = vperm.xlu1 %1702, %v654_v15   ;;  %v1205_v15 = vld [vmem:[%s2591_s5 + $0xf8] sm:$0xff] }
  0x76   :  { %793 = vperm.xlu0 %1701, %v655_v18  }
  0x77   :  { %798 = vperm.xlu1 %1702, %v656_v17  }
  0x7a   :  { %803 = vperm.xlu0 %1701, %v657_v20  }
  0x7b   :  { %1208 = vperm.xlu1 %1702, %v1174_v19  }
  0x7d   :  { %v2099_v23 = vpop.permute.xlu0 %251 }
  0x7e   :  { %v2101_v24 = vpop.permute.xlu1 %171  ;;  %1213 = vperm.xlu0 %1701, %v1175_v22  }
  0x7f   :  { %1218 = vperm.xlu1 %1702, %v1176_v21  }
  0x81   :  { %v2109_v27 = vpop.permute.xlu0 %256 }
  0x82   :  { %v2111_v28 = vpop.permute.xlu1 %176  ;;  %1223 = vperm.xlu0 %1701, %v1177_v26  }
  0x83   :  { %1228 = vperm.xlu1 %1702, %v1178_v25  }
  0x85   :  { %v2119_v31 = vpop.permute.xlu0 %241 }
  0x86   :  { %v2121_v32 = vpop.permute.xlu1 %246  ;;  %1233 = vperm.xlu0 %1701, %v1179_v30  }
  0x87   :  { %1238 = vperm.xlu1 %1702, %v1180_v29  }
  0x89   :  { %v2129_v35 = vpop.permute.xlu0 %161 }
  0x8a   :  { %v2131_v36 = vpop.permute.xlu1 %166  ;;  %1243 = vperm.xlu0 %1701, %v1181_v34  }
  0x8b   :  { %1248 = vperm.xlu1 %1702, %v1182_v33  }
  0x8d   :  { %v2139_v39 = vpop.permute.xlu0 %231 }
  0x8e   :  { %1253 = vperm.xlu0 %1701, %v1183_v38   ;;  %v2147_v42 = vpop.permute.xlu1 %236 }
  0x8f   :  { %1258 = vperm.xlu1 %1702, %v1184_v37  }
  0x91   :  { %v2155_v45 = vpop.permute.xlu0 %151 }
  0x92   :  { %1263 = vperm.xlu0 %1701, %v1185_v41   ;;  %v2157_v46 = vpop.permute.xlu1 %156 }
  0x93   :  { %1268 = vperm.xlu1 %1702, %v1186_v40  }
  0x95   :  { %v2165_v49 = vpop.permute.xlu0 %221 }
  0x96   :  { %1273 = vperm.xlu0 %1701, %v1187_v44   ;;  %v2173_v52 = vpop.permute.xlu1 %226 }
  0x97   :  { %1278 = vperm.xlu1 %1702, %v1188_v43  }
  0x99   :  { %v2181_v55 = vpop.permute.xlu0 %141 }
  0x9a   :  { %1283 = vperm.xlu0 %1701, %v1189_v48   ;;  %v2183_v56 = vpop.permute.xlu1 %146 }
  0x9b   :  { %1288 = vperm.xlu1 %1702, %v1190_v47  }
  0x9d   :  { %v2191_v59 = vpop.permute.xlu0 %211 }
  0x9e   :  { %1293 = vperm.xlu0 %1701, %v1191_v51   ;;  %v2199_v62 = vpop.permute.xlu1 %216 }
  0x9f   :  { %1298 = vperm.xlu1 %1702, %v1192_v50  }
  0xa1   :  { %v132_v1 = vpop.permute.xlu0 %131 }
  0xa2   :  { %1303 = vperm.xlu0 %1701, %v1193_v54   ;;  %v137_v4 = vpop.permute.xlu1 %136 }
  0xa3   :  { %1308 = vperm.xlu1 %1702, %v1194_v53  }
  0xa5   :  { %v2219_v7 = vpop.permute.xlu0 %201 }
  0xa6   :  { %1313 = vperm.xlu0 %1701, %v1195_v58   ;;  %v2227_v10 = vpop.permute.xlu1 %206 }
  0xa7   :  { %1318 = vperm.xlu1 %1702, %v1196_v57  }
  0xa9   :  { %v122_v13 = vpop.permute.xlu0 %121 }
  0xaa   :  { %1323 = vperm.xlu0 %1701, %v1197_v61   ;;  %v127_v14 = vpop.permute.xlu1 %126 }
  0xab   :  { %1328 = vperm.xlu1 %1702, %v1198_v60  }
  0xad   :  { %v2241_v17 = vpop.permute.xlu0 %191 }
  0xae   :  { %1333 = vperm.xlu0 %1701, %v1199_v0   ;;  %v2243_v18 = vpop.permute.xlu1 %196 }
  0xaf   :  { %1338 = vperm.xlu1 %1702, %v1200_v63  }
  0xb1   :  { %v112_v19 = vpop.permute.xlu0 %111 }
  0xb2   :  { %808 = vperm.xlu0 %1701, %v658_v6   ;;  %v117_v20 = vpop.permute.xlu1 %116 }
  0xb3   :  { %1343 = vperm.xlu1 %1702, %v1201_v5  }
  0xb5   :  { %v2245_v21 = vpop.permute.xlu0 %181 }
  0xb6   :  { %813 = vperm.xlu0 %1701, %v659_v9   ;;  %v2247_v22 = vpop.permute.xlu1 %186 }
  0xb7   :  { %1348 = vperm.xlu1 %1702, %v1202_v8  }
  0xb9   :  { %v102_v30 = vpop.permute.xlu0 %101 }
  0xba   :  { %818 = vperm.xlu0 %1701, %v660_v12   ;;  %v107_v38 = vpop.permute.xlu1 %106 }
  0xbb   :  { %1353 = vperm.xlu1 %1702, %v1203_v11  }
  0xbe   :  { %1358 = vperm.xlu0 %1701, %v1204_v16  }
  0xbf   :  { %1363 = vperm.xlu1 %1702, %v1205_v15  }
  0xce   :  { %v1653_v25 = vpop.f32.mrf.mxu0 }
  0xcf   :  { %v431_v29 = vadd.f32 %v1653_v25, %v112_v19 }
  0xd0   :  { %v422_v26 = vpop.f32.mrf.mxu0 }
  0xd1   :  { %v423_v34 = vadd.f32 %v422_v26, %v102_v30  ;;  %v551_v41 = vmax.f32 %v431_v29, 0.0 }
  0xd2   :  { %v1654_v33 = vpop.f32.mrf.mxu0 }
  0xd3   :  { %v434_v37 = vadd.f32 %v1654_v33, %v117_v20  ;;  %v549_v48 = vmax.f32 %v423_v34, 0.0 }
  0xd4   :  { %v425_v40 = vpop.f32.mrf.mxu0 }
  0xd5   :  { %v552_v43 = vmax.f32 %v434_v37, 0.0  ;;  %v426_v44 = vadd.f32 %v425_v40, %v107_v38 }
  0xd6   :  { %v1657_v47 = vpop.f32.mrf.mxu0 }
  0xd7   :  { %v2249_v50 = vpack.c.bf16 %v552_v43, %v551_v41  ;;  %v550_v51 = vmax.f32 %v426_v44, 0.0  ;;  %v447_v57 = vadd.f32 %v1657_v47, %v132_v1 }
  0xd8   :  { %v438_v53 = vpop.f32.mrf.mxu0 }
  0xd9   :  { %v2251_v54 = vpack.c.bf16 %v550_v51, %v549_v48  ;;  %v439_v60 = vadd.f32 %v438_v53, %v122_v13  ;;  %v555_v0 = vmax.f32 %v447_v57, 0.0 }
  0xda   :  { %v1658_v58 = vpop.f32.mrf.mxu0 }
  0xdb   :  { %v450_v61 = vadd.f32 %v1658_v58, %v137_v4  ;;  %v553_v6 = vmax.f32 %v439_v60, 0.0 }
  0xdc   :  { %v441_v63 = vpop.f32.mrf.mxu0 }
  0xdd   :  { %v556_v2 = vmax.f32 %v450_v61, 0.0  ;;  %v442_v3 = vadd.f32 %v441_v63, %v127_v14 }
  0xde   :  { %v1661_v5 = vpop.f32.mrf.mxu0 }
  0xdf   :  { %v2253_v8 = vpack.c.bf16 %v556_v2, %v555_v0  ;;  %v554_v9 = vmax.f32 %v442_v3, 0.0 }
  0xe0   :  { %v2255_v11 = vpop.f32.mrf.mxu0 }
  0xe1   :  { %v2257_v12 = vpack.c.bf16 %v554_v9, %v553_v6 }
  0xe2   :  { %v1662_v15 = vpop.f32.mrf.mxu0 }
  0xe4   :  { %v457_v16 = vpop.f32.mrf.mxu0 }
  0xe6   :  { %v1665_v19 = vpop.f32.mrf.mxu0 }
  0xe7   :  { %v479_v51 = vadd.f32 %v1665_v19, %v2101_v24 }
  0xe8   :  { %v470_v1 = vpop.f32.mrf.mxu0 }
  0xe9   :  { %v563_v6 = vmax.f32 %v479_v51, 0.0 }
  0xea   :  { %v1666_v20 = vpop.f32.mrf.mxu0 }
  0xeb   :  { %v482_v44 = vadd.f32 %v1666_v20, %v2111_v28 }
  0xec   :  { %v473_v13 = vpop.f32.mrf.mxu0 }
  0xed   :  { %v564_v60 = vmax.f32 %v482_v44, 0.0  ;;  %v474_v61 = vadd.f32 %v473_v13, %v2131_v36 }
  0xee   :  { %v2259_v4 = vpop.f32.mrf.mxu0 }
  0xef   :  { %v620_v20 = vpack.c.bf16 %v564_v60, %v563_v6  ;;  %v1735_v60 = vld [vmem:[%s2589_s3 + $0x20] ss:$8 sps:$4 sm:$0xff]   ;;  %v1745_v6 = vld [vmem:[%s2589_s3 + $0x94] ss:$8 sps:$4 sm:$0xff]  }
  0xf0   :  { %v2261_v25 = vpop.f32.mrf.mxu0 }
  0xf2   :  { %v2263_v14 = vpop.f32.mrf.mxu0 }
  0xf4   :  { %v2265_v26 = vpop.f32.mrf.mxu0 }
  0xf6   :  { %v1673_v29 = vpop.f32.mrf.mxu0 }
  0xf8   :  { %v2267_v30 = vpop.f32.mrf.mxu0 }
  0xfa   :  { %v1674_v33 = vpop.f32.mrf.mxu0 }
  0xfc   :  { %v505_v34 = vpop.f32.mrf.mxu0 }
  0xfe   :  { %v1677_v37 = vpop.f32.mrf.mxu0 }
  0xff   :  { %v527_v24 = vadd.f32 %v1677_v37, %v2139_v39  ;;  %v514_v37 = vadd.f32 %v1674_v33, %v2199_v62 }
 0x100   :  { %v518_v38 = vpop.f32.mrf.mxu0 }
 0x101   :  { %v519_v39 = vadd.f32 %v518_v38, %v2165_v49 }
 0x102   :  { %v1678_v40 = vpop.f32.mrf.mxu0 }
 0x103   :  { %v530_v0 = vadd.f32 %v1678_v40, %v2147_v42 }
 0x104   :  { %v521_v41 = vpop.f32.mrf.mxu0 }
 0x105   :  { %v576_v36 = vmax.f32 %v530_v0, 0.0  ;;  %v522_v13 = vadd.f32 %v521_v41, %v2173_v52  ;;  %v1739_v0 = vld [vmem:[%s2589_s3 + $0x84] ss:$8 sps:$4 sm:$0xff]  }
 0x106   :  { %v1681_v43 = vpop.f32.mrf.mxu0 }
 0x107   :  { %v543_v48 = vadd.f32 %v1681_v43, %v2099_v23  ;;  %v471_v23 = vadd.f32 %v470_v1, %v2129_v35  ;;  %v562_v43 = vmax.f32 %v474_v61, 0.0  ;;  %v575_v35 = vmax.f32 %v527_v24, 0.0  ;;  %v1736_v61 = vld [vmem:[%s2589_s3 + $0x70] ss:$8 sps:$4 sm:$0xff]  }
 0x108   :  { %v534_v47 = vpop.f32.mrf.mxu0  ;;  %v574_v41 = vmax.f32 %v522_v13, 0.0  ;;  %v1748_v24 = vld [vmem:[%s2589_s3 + $0x90] ss:$8 sps:$4 sm:$0xff]  }
 0x109   :  { %v535_v57 = vadd.f32 %v534_v47, %v2119_v31  ;;  %v579_v2 = vmax.f32 %v543_v48, 0.0  ;;  %v561_v40 = vmax.f32 %v471_v23, 0.0  ;;  %v626_v52 = vpack.c.bf16 %v576_v36, %v575_v35  ;;  %v1747_v23 = vld [vmem:[%s2589_s3 + $0x40] ss:$8 sps:$4 sm:$0xff]   ;;  %v1758_v36 = vld [vmem:[%s2589_s3 + $0xd4] ss:$8 sps:$4 sm:$0xff]  }
 0x10a   :  { %v1682_v53 = vpop.f32.mrf.mxu0  ;;  %v573_v47 = vmax.f32 %v519_v39, 0.0  ;;  %v572_v48 = vmax.f32 %v514_v37, 0.0  ;;  %v1760_v13 = vld [vmem:[%s2589_s3 + $0xd0] ss:$8 sps:$4 sm:$0xff]   ;;  %v2397_v39 = vpop.permute.xlu0 %663 }
 0x10b   :  { %v546_v58 = vadd.f32 %v1682_v53, %v2109_v27  ;;  %v577_v9 = vmax.f32 %v535_v57, 0.0  ;;  %v466_v27 = vadd.f32 %v1662_v15, %v2157_v46  ;;  %v458_v46 = vadd.f32 %v457_v16, %v2183_v56  ;;  %v1766_v35 = vld [vmem:[%s2589_s3 + $0xf0] ss:$8 sps:$4 sm:$0xff]  }
 0x10c   :  { %v537_v63 = vpop.f32.mrf.mxu0  ;;  %v619_v15 = vpack.c.bf16 %v562_v43, %v561_v40  ;;  %v506_v56 = vadd.f32 %v505_v34, %v2227_v10  ;;  %v625_v16 = vpack.c.bf16 %v574_v41, %v573_v47  ;;  %v495_v10 = vadd.f32 %v2259_v4, %v2241_v17  ;;  %v1757_v43 = vld [vmem:[%s2589_s3 + $0xc0] ss:$8 sps:$4 sm:$0xff]   ;;  %v1764_v40 = vld [vmem:[%s2589_s3 + $0xf4] ss:$8 sps:$4 sm:$0xff]  }
 0x10d   :  { %v580_v3 = vmax.f32 %v546_v58, 0.0  ;;  %v538_v28 = vadd.f32 %v537_v63, %v2121_v32  ;;  %v463_v32 = vadd.f32 %v1661_v5, %v2155_v45  ;;  %v560_v1 = vmax.f32 %v466_v27, 0.0  ;;  %v1733_v58 = vld [vmem:[%s2589_s3 + $0x74] ss:$8 sps:$4 sm:$0xff]   ;;  %v1754_v27 = vld [vmem:[%s2589_s3 + $0xb0] ss:$8 sps:$4 sm:$0xff]  }
 0x10e   :  { %v455_v45 = vadd.f32 %v2255_v11, %v2181_v55  ;;  %v511_v5 = vadd.f32 %v1673_v29, %v2191_v59  ;;  %v558_v38 = vmax.f32 %v458_v46, 0.0  ;;  %v503_v55 = vadd.f32 %v2267_v30, %v2219_v7  ;;  %v1737_v63 = vld [vmem:[%s2589_s3 + $0x34] ss:$8 sps:$4 sm:$0xff]   ;;  %v2399_v46 = vpop.permute.xlu0 %673 }
 0x10f   :  { %v628_v19 = vpack.c.bf16 %v580_v3, %v579_v2  ;;  %v578_v31 = vmax.f32 %v538_v28, 0.0  ;;  %v559_v44 = vmax.f32 %v463_v32, 0.0  ;;  %v498_v59 = vadd.f32 %v2263_v14, %v2243_v18  ;;  %v1741_v2 = vld [vmem:[%s2589_s3 + $0x30] ss:$8 sps:$4 sm:$0xff]   ;;  %v1742_v3 = vld [vmem:[%s2589_s3 + $0x80] ss:$8 sps:$4 sm:$0xff]  }
 0x110   :  { %v557_v62 = vmax.f32 %v455_v45, 0.0  ;;  %v571_v33 = vmax.f32 %v511_v5, 0.0  ;;  %v570_v51 = vmax.f32 %v506_v56, 0.0  ;;  %v569_v34 = vmax.f32 %v503_v55, 0.0  ;;  %v1743_v28 = vld [vmem:[%s2589_s3 + $0x44] ss:$8 sps:$4 sm:$0xff]  }
 0x111   :  { %v627_v42 = vpack.c.bf16 %v578_v31, %v577_v9  ;;  %1535 = vmatprep.subr.bf16.mxu0 %v628_v19  ;;  %1683 = vmatprep.subr.bf16.mxu1 %v628_v19  ;;  %v618_v49 = vpack.c.bf16 %v560_v1, %v559_v44  ;;  %v568_v53 = vmax.f32 %v498_v59, 0.0  ;;  %v490_v7 = vadd.f32 %v2265_v26, %v2247_v22  ;;  %v1731_v26 = vld [vmem:[%s2589_s3 + $0x24] ss:$8 sps:$4 sm:$0xff]   ;;  %v1751_v19 = vld [vmem:[%s2589_s3 + $0xa0] ss:$8 sps:$4 sm:$0xff]   ;;  %v669_v1 = vpop.permute.xlu1 %668 }
 0x112   :  { %1536 = vmatpush3.bf16.msra.mxu0 %v620_v20  ;;  %1691 = vmatpush3.bf16.msra.mxu1 %v620_v20  ;;  %v617_v11 = vpack.c.bf16 %v558_v38, %v557_v62  ;;  %v624_v29 = vpack.c.bf16 %v572_v48, %v571_v33  ;;  %v623_v30 = vpack.c.bf16 %v570_v51, %v569_v34  ;;  %v567_v18 = vmax.f32 %v495_v10, 0.0  ;;  %v1749_v9 = vld [vmem:[%s2589_s3 + $0xa4] ss:$8 sps:$4 sm:$0xff]   ;;  %v1752_v31 = vld [vmem:[%s2589_s3 + $0xb4] ss:$8 sps:$4 sm:$0xff]   ;;  %v2403_v37 = vpop.permute.xlu0 %683 }
 0x113   :  { %1537 = vmatprep.subr.bf16.mxu0 %v627_v42  ;;  %1684 = vmatprep.subr.bf16.mxu1 %v627_v42  ;;  %v487_v14 = vadd.f32 %v2261_v25, %v2245_v21  ;;  %v566_v17 = vmax.f32 %v490_v7, 0.0  ;;  %v1719_v21 = vld [vmem:[%s2589_s3 + $0x50] ss:$8 sps:$4 sm:$0xff]   ;;  %v1755_v20 = vld [vmem:[%s2589_s3 + $0xc4] ss:$8 sps:$4 sm:$0xff]  }
 0x114   :  { %v622_v57 = vpack.c.bf16 %v568_v53, %v567_v18  ;;  %v1729_v25 = vld [vmem:[%s2589_s3 + $0x10] ss:$8 sps:$4 sm:$0xff]   ;;  %v1761_v42 = vld [vmem:[%s2589_s3 + $0xe4] ss:$8 sps:$4 sm:$0xff]   ;;  %v1763_v32 = vld [vmem:[%s2589_s3 + $0xe0] ss:$8 sps:$4 sm:$0xff]  }
 0x115   :  { %v565_v4 = vmax.f32 %v487_v14, 0.0 }
 0x116   :  { %1538 = vmatpush3.bf16.msra.mxu0 %v619_v15  ;;  %1692 = vmatpush3.bf16.msra.mxu1 %v619_v15  ;;  %v2401_v15 = vpop.permute.xlu1 %678  ;;  %v2407_v41 = vpop.permute.xlu0 %693 }
 0x117   :  { %1539 = vmatprep.subr.bf16.mxu0 %v626_v52  ;;  %1685 = vmatprep.subr.bf16.mxu1 %v626_v52  ;;  %v621_v22 = vpack.c.bf16 %v566_v17, %v565_v4 }
 0x11a   :  { %1540 = vmatpush3.bf16.msra.mxu0 %v618_v49  ;;  %1693 = vmatpush3.bf16.msra.mxu1 %v618_v49  ;;  %v2405_v52 = vpop.permute.xlu1 %688  ;;  %v2411_v45 = vpop.permute.xlu0 %703 }
 0x11b   :  { %1541 = vmatprep.subr.bf16.mxu0 %v625_v16  ;;  %1686 = vmatprep.subr.bf16.mxu1 %v625_v16 }
 0x11e   :  { %1542 = vmatpush3.bf16.msra.mxu0 %v617_v11  ;;  %1694 = vmatpush3.bf16.msra.mxu1 %v617_v11  ;;  %v2409_v44 = vpop.permute.xlu1 %698  ;;  %v2415_v47 = vpop.permute.xlu0 %713 }
 0x11f   :  { %1543 = vmatprep.subr.bf16.mxu0 %v624_v29  ;;  %1687 = vmatprep.subr.bf16.mxu1 %v624_v29 }
 0x122   :  { %1544 = vmatpush3.bf16.msra.mxu0 %v2253_v8  ;;  %1695 = vmatpush3.bf16.msra.mxu1 %v2253_v8  ;;  %v1722_v8 = vld [vmem:[%s2589_s3] ss:$8 sps:$4 sm:$0xff]   ;;  %v2413_v5 = vpop.permute.xlu1 %708  ;;  %v2419_v38 = vpop.permute.xlu0 %723 }
 0x123   :  { %1545 = vmatprep.subr.bf16.mxu0 %v623_v30  ;;  %1688 = vmatprep.subr.bf16.mxu1 %v623_v30 }
 0x126   :  { %1546 = vmatpush3.bf16.msra.mxu0 %v2257_v12  ;;  %1696 = vmatpush3.bf16.msra.mxu1 %v2257_v12  ;;  %v1725_v12 = vld [vmem:[%s2589_s3 + $0x14] ss:$8 sps:$4 sm:$0xff]   ;;  %v2417_v49 = vpop.permute.xlu1 %718  ;;  %v2423_v56 = vpop.permute.xlu0 %733 }
 0x127   :  { %1547 = vmatprep.subr.bf16.mxu0 %v622_v57  ;;  %1689 = vmatprep.subr.bf16.mxu1 %v622_v57 }
 0x12a   :  { %1548 = vmatpush3.bf16.msra.mxu0 %v2249_v50  ;;  %1697 = vmatpush3.bf16.msra.mxu1 %v2249_v50  ;;  %v1727_v50 = vld [vmem:[%s2589_s3 + $0x64] ss:$8 sps:$4 sm:$0xff]   ;;  %v2421_v48 = vpop.permute.xlu1 %728  ;;  %v2427_v62 = vpop.permute.xlu0 %743 }
 0x12b   :  { %1549 = vmatprep.subr.bf16.mxu0 %v621_v22  ;;  %1690 = vmatprep.subr.bf16.mxu1 %v621_v22 }
 0x12e   :  { %1550 = vmatpush3.bf16.msra.mxu0 %v2251_v54  ;;  %1698 = vmatpush3.bf16.msra.mxu1 %v2251_v54  ;;  %v1730_v54 = vld [vmem:[%s2589_s3 + $0x60] ss:$8 sps:$4 sm:$0xff]   ;;  %v2425_v16 = vpop.permute.xlu1 %738  ;;  %v2431_v55 = vpop.permute.xlu0 %753 }
 0x131   :  { %1014 = vmatmul.mubr.bf16.vlgmr.msra.gmra.mxu0 %v1722_v8  ;;  %1054 = vmatmul.mubr.bf16.vlgmr.msra.gmra.mxu1 %v1719_v21 }
 0x132   :  { %1021 = vmatprep.mubr.bf16.mxu0 %v1725_v12  ;;  %1061 = vmatprep.mubr.bf16.mxu1 %v1727_v50  ;;  %v2429_v33 = vpop.permute.xlu1 %748  ;;  %v2435_v59 = vpop.permute.xlu0 %763 }
 0x133   :  { %2595 = vst [vmem:[#allocation7_spill] sm:$0xff] %v2435_v59 }
 0x136   :  { %v2433_v11 = vpop.permute.xlu1 %758  ;;  %v2439_v51 = vpop.permute.xlu0 %773 }
 0x137   :  { %2594 = vst [vmem:[#allocation6_spill] sm:$0xff] %v2433_v11  ;;  %2597 = vst [vmem:[#allocation9_spill] sm:$0xff] %v2439_v51 }
 0x139   :  { %1022 = vmatmul.mubr.bf16.gmra.mxu0 %v1729_v25  ;;  %1062 = vmatmul.mubr.bf16.gmra.mxu1 %v1730_v54 }
 0x13a   :  { %1029 = vmatprep.mubr.bf16.mxu0 %v1731_v26  ;;  %1069 = vmatprep.mubr.bf16.mxu1 %v1733_v58  ;;  %v2437_v29 = vpop.permute.xlu1 %768  ;;  %v2443_v34 = vpop.permute.xlu0 %783 }
 0x13b   :  { %2596 = vst [vmem:[#allocation8_spill] sm:$0xff] %v2437_v29  ;;  %2599 = vst [vmem:[#allocation11_spill] sm:$0xff] %v2443_v34 }
 0x13e   :  { %v2441_v10 = vpop.permute.xlu1 %778  ;;  %v2447_v7 = vpop.permute.xlu0 %793 }
 0x13f   :  { %2598 = vst [vmem:[#allocation10_spill] sm:$0xff] %v2441_v10  ;;  %2601 = vst [vmem:[#allocation13_spill] sm:$0xff] %v2447_v7 }
 0x141   :  { %1030 = vmatmul.mubr.bf16.gmra.mxu0 %v1735_v60  ;;  %1070 = vmatmul.mubr.bf16.gmra.mxu1 %v1736_v61 }
 0x142   :  { %1037 = vmatprep.mubr.bf16.mxu0 %v1737_v63  ;;  %1077 = vmatprep.mubr.bf16.mxu1 %v1739_v0  ;;  %v2445_v53 = vpop.permute.xlu1 %788  ;;  %v2451_v18 = vpop.permute.xlu0 %803 }
 0x143   :  { %2600 = vst [vmem:[#allocation12_spill] sm:$0xff] %v2445_v53  ;;  %2603 = vst [vmem:[#allocation15_spill] sm:$0xff] %v2451_v18 }
 0x146   :  { %v2449_v30 = vpop.permute.xlu1 %798  ;;  %v1214_v57 = vpop.permute.xlu0 %1213 }
 0x147   :  { %2602 = vst [vmem:[#allocation14_spill] sm:$0xff] %v2449_v30 }
 0x149   :  { %1038 = vmatmul.mubr.bf16.gmra.mxu0 %v1741_v2  ;;  %1078 = vmatmul.mubr.bf16.gmra.mxu1 %v1742_v3 }
 0x14a   :  { %1045 = vmatprep.mubr.bf16.mxu0 %v1743_v28  ;;  %1085 = vmatprep.mubr.bf16.mxu1 %v1745_v6  ;;  %v1209_v14 = vpop.permute.xlu1 %1208  ;;  %v2453_v4 = vpop.permute.xlu0 %1223 }
 0x14e   :  { %v1219_v17 = vpop.permute.xlu1 %1218  ;;  %v2461_v25 = vpop.permute.xlu0 %1233 }
 0x151   :  { %1046 = vmatmul.mubr.bf16.gmra.mxu0 %v1747_v23  ;;  %1086 = vmatmul.mubr.bf16.gmra.mxu1 %v1748_v24 }
 0x152   :  { %1093 = vmatprep.mubr.bf16.mxu1 %v1749_v9  ;;  %v2457_v8 = vpop.permute.xlu1 %1228  ;;  %v2471_v2 = vpop.permute.xlu0 %1243 }
 0x156   :  { %v2467_v61 = vpop.permute.xlu1 %1238 }
 0x159   :  { %1094 = vmatmul.mubr.bf16.gmra.mxu1 %v1751_v19 }
 0x15a   :  { %1101 = vmatprep.mubr.bf16.mxu1 %v1752_v31  ;;  %v2477_v24 = vpop.permute.xlu1 %1248  ;;  %v2481_v31 = vpop.permute.xlu0 %1253 }
 0x15e   :  { %v2491_v53 = vpop.permute.xlu0 %1263 }
 0x161   :  { %1102 = vmatmul.mubr.bf16.gmra.mxu1 %v1754_v27 }
 0x162   :  { %1109 = vmatprep.mubr.bf16.mxu1 %v1755_v20 }
 0x169   :  { %1110 = vmatmul.mubr.bf16.gmra.mxu1 %v1757_v43 }
 0x16a   :  { %1117 = vmatprep.mubr.bf16.mxu1 %v1758_v36 }
 0x171   :  { %1118 = vmatmul.mubr.bf16.gmra.mxu1 %v1760_v13 }
 0x172   :  { %1125 = vmatprep.mubr.bf16.mxu1 %v1761_v42 }
 0x179   :  { %1126 = vmatmul.mubr.bf16.gmra.mxu1 %v1763_v32 }
 0x17a   :  { %1133 = vmatprep.mubr.bf16.mxu1 %v1764_v40  ;;  %v2487_v40 = vpop.permute.xlu1 %1258 }
 0x181   :  { %1134 = vmatmul.mubr.bf16.gmra.mxu1 %v1766_v35 }
 0x1f1   :  { %v1551_v22 = vpop.f32.mrf.mxu0  ;;  %v2455_v21 = vpop.f32.mrf.mxu1 }
 0x1f3   :  { %v1552_v12 = vpop.f32.mrf.mxu0  ;;  %v2459_v50 = vpop.f32.mrf.mxu1 }
 0x1f4   :  { %v1553_v36 = vadd.f32 %v1552_v12, %v1551_v22 }
 0x1f5   :  { %v1554_v54 = vpop.f32.mrf.mxu0  ;;  %v2463_v26 = vpop.f32.mrf.mxu1 }
 0x1f6   :  { %v1016_v34 = vadd.f32 %v1553_v36, %v2397_v39 }
 0x1f7   :  { %v1555_v58 = vpop.f32.mrf.mxu0  ;;  %v2465_v60 = vpop.f32.mrf.mxu1 }
 0x1f8   :  { %v1556_v27 = vadd.f32 %v1555_v58, %v1554_v54 }
 0x1f9   :  { %v1557_v63 = vpop.f32.mrf.mxu0  ;;  %v2469_v0 = vpop.f32.mrf.mxu1 }
 0x1fa   :  { %v1019_v35 = vadd.f32 %v1556_v27, %v669_v1 }
 0x1fb   :  { %v1558_v3 = vpop.f32.mrf.mxu0  ;;  %v2473_v28 = vpop.f32.mrf.mxu1 }
 0x1fc   :  { %v1559_v13 = vadd.f32 %v1558_v3, %v1557_v63  ;;  %v1143_v12 = vmax.f32 %v1019_v35, 0.0 }
 0x1fd   :  { %v1560_v6 = vpop.f32.mrf.mxu0  ;;  %v2475_v23 = vpop.f32.mrf.mxu1 }
 0x1fe   :  { %v1024_v54 = vadd.f32 %v1559_v13, %v2399_v46  ;;  %v2505_v46 = vpop.permute.xlu0 %1273 }
 0x1ff   :  { %v1561_v9 = vpop.f32.mrf.mxu0  ;;  %v2479_v19 = vpop.f32.mrf.mxu1 }
 0x200   :  { %v1562_v18 = vadd.f32 %v1561_v9, %v1560_v6  ;;  %v2500_v6 = vpop.permute.xlu1 %1268  ;;  %v1142_v9 = vmax.f32 %v1016_v34, 0.0  ;;  %v1144_v27 = vmax.f32 %v1024_v54, 0.0 }
 0x201   :  { %v1563_v20 = vpop.f32.mrf.mxu0  ;;  %v2483_v43 = vpop.f32.mrf.mxu1 }
 0x202   :  { %v1027_v63 = vadd.f32 %v1562_v18, %v2401_v15  ;;  %v1366_v18 = vmul.f32 %v1209_v14, %v1142_v9  ;;  %v1368_v35 = vmul.f32 %v1219_v17, %v1144_v27  ;;  %v1583_v9 = vadd.f32 %v2459_v50, %v2455_v21 }
 0x203   :  { %v1564_v42 = vpop.f32.mrf.mxu0  ;;  %v2485_v32 = vpop.f32.mrf.mxu1  ;;  %v1589_v50 = vadd.f32 %v2473_v28, %v2469_v0 }
 0x204   :  { %v1565_v58 = vadd.f32 %v1564_v42, %v1563_v20  ;;  %v1367_v20 = vmul.f32 %v1214_v57, %v1143_v12  ;;  %v1145_v13 = vmax.f32 %v1027_v63, 0.0  ;;  %v1056_v21 = vadd.f32 %v1583_v9, %v2415_v47 }
 0x205   :  { %v1566_v30 = vpop.f32.mrf.mxu0  ;;  %v2489_v7 = vpop.f32.mrf.mxu1  ;;  %v1595_v28 = vadd.f32 %v2485_v32, %v2483_v43 }
 0x206   :  { %v1032_v29 = vadd.f32 %v1565_v58, %v2403_v37  ;;  %v2513_v58 = vpop.permute.xlu1 %1278  ;;  %v1398_v11 = vadd.f32 %v1367_v20, %v1366_v18  ;;  %v1369_v57 = vmul.f32 %v2453_v4, %v1145_v13 }
 0x207   :  { %v1567_v10 = vpop.f32.mrf.mxu0  ;;  %v2495_v22 = vpop.f32.mrf.mxu1  ;;  %v1072_v43 = vadd.f32 %v1595_v28, %v2423_v56 }
 0x208   :  { %v1568_v3 = vadd.f32 %v1567_v10, %v1566_v30  ;;  %v1146_v59 = vmax.f32 %v1032_v29, 0.0  ;;  %v1399_v14 = vadd.f32 %v1398_v11, %v1368_v35 }
 0x209   :  { %v1569_v51 = vpop.f32.mrf.mxu0  ;;  %v2498_v1 = vpop.f32.mrf.mxu1  ;;  %v1156_v56 = vmax.f32 %v1072_v43, 0.0 }
 0x20a   :  { %v1035_v42 = vadd.f32 %v1568_v3, %v2405_v52  ;;  %v2518_v3 = vpop.permute.xlu0 %1283  ;;  %v1370_v29 = vmul.f32 %v2457_v8, %v1146_v59  ;;  %v1400_v20 = vadd.f32 %v1399_v14, %v1369_v57  ;;  %v2527_v18 = vpop.permute.xlu1 %1288  ;;  %v1064_v14 = vadd.f32 %v1589_v50, %v2419_v38 }
 0x20b   :  { %v1570_v39 = vpop.f32.mrf.mxu0  ;;  %v2503_v36 = vpop.f32.mrf.mxu1 }
 0x20c   :  { %v1571_v15 = vadd.f32 %v1570_v39, %v1569_v51  ;;  %v1147_v12 = vmax.f32 %v1035_v42, 0.0  ;;  %v1401_v59 = vadd.f32 %v1400_v20, %v1370_v29  ;;  %v1154_v20 = vmax.f32 %v1064_v14, 0.0 }
 0x20d   :  { %v1572_v10 = vpop.f32.mrf.mxu0  ;;  %v2508_v30 = vpop.f32.mrf.mxu1 }
 0x20e   :  { %v1040_v34 = vadd.f32 %v1571_v15, %v2407_v41  ;;  %v1371_v4 = vmul.f32 %v2461_v25, %v1147_v12  ;;  %v1586_v15 = vadd.f32 %v2465_v60, %v2463_v26  ;;  %v2535_v57 = vpop.permute.xlu0 %1293 }
 0x20f   :  { %v1573_v54 = vpop.f32.mrf.mxu0  ;;  %v2511_v37 = vpop.f32.mrf.mxu1 }
 0x210   :  { %v1574_v63 = vadd.f32 %v1573_v54, %v1572_v10  ;;  %v1148_v17 = vmax.f32 %v1040_v34, 0.0  ;;  %v1402_v34 = vadd.f32 %v1401_v59, %v1371_v4  ;;  %v1059_v12 = vadd.f32 %v1586_v15, %v2417_v49 }
 0x211   :  { %v1575_v52 = vpop.f32.mrf.mxu0  ;;  %v2516_v51 = vpop.f32.mrf.mxu1  ;;  %v1601_v4 = vadd.f32 %v2503_v36, %v2498_v1 }
 0x212   :  { %v1043_v41 = vadd.f32 %v1574_v63, %v2409_v44  ;;  %v1372_v44 = vmul.f32 %v2467_v61, %v1148_v17  ;;  %v1153_v49 = vmax.f32 %v1059_v12, 0.0 }
 0x213   :  { %v1576_v27 = vpop.f32.mrf.mxu0  ;;  %v1606_v39 = vpop.f32.mrf.mxu1 }
 0x214   :  { %v1149_v13 = vmax.f32 %v1043_v41, 0.0  ;;  %v1577_v42 = vadd.f32 %v1576_v27, %v1575_v52  ;;  %v1403_v61 = vadd.f32 %v1402_v34, %v1372_v44  ;;  %v2545_v41 = vpop.permute.xlu1 %1298  ;;  %v1304_v27 = vpop.permute.xlu0 %1303  ;;  %v1080_v44 = vadd.f32 %v1601_v4, %v2427_v62 }
 0x215   :  { %v1578_v10 = vpop.f32.mrf.mxu0  ;;  %v1608_v11 = vpop.f32.mrf.mxu1  ;;  %v1607_v1 = vadd.f32 %v1606_v39, %v2516_v51  ;;  %v2604_v51 = vld [vmem:[#allocation6_spill] sm:$0xff] }
 0x216   :  { %v1048_v8 = vadd.f32 %v1577_v42, %v2411_v45  ;;  %v1373_v54 = vmul.f32 %v2471_v2, %v1149_v13  ;;  %v1592_v45 = vadd.f32 %v2479_v19, %v2475_v23  ;;  %v1152_v2 = vmax.f32 %v1056_v21, 0.0 }
 0x217   :  { %v1579_v25 = vpop.f32.mrf.mxu0  ;;  %v1609_v35 = vpop.f32.mrf.mxu1  ;;  %v1377_v42 = vmul.f32 %v2491_v53, %v1153_v49 }
 0x218   :  { %v1150_v26 = vmax.f32 %v1048_v8, 0.0  ;;  %v1580_v60 = vadd.f32 %v1579_v25, %v1578_v10  ;;  %v1404_v29 = vadd.f32 %v1403_v61, %v1373_v54  ;;  %v1067_v23 = vadd.f32 %v1592_v45, %v2421_v48  ;;  %v1309_v10 = vpop.permute.xlu1 %1308  ;;  %v1314_v8 = vpop.permute.xlu0 %1313 }
 0x219   :  { %v1611_v63 = vpop.f32.mrf.mxu1  ;;  %v1376_v38 = vmul.f32 %v2487_v40, %v1152_v2  ;;  %v1378_v40 = vmul.f32 %v2500_v6, %v1154_v20  ;;  %v1610_v53 = vadd.f32 %v1609_v35, %v1608_v11  ;;  %v1158_v54 = vmax.f32 %v1080_v44, 0.0  ;;  %v2605_v2 = vld [vmem:[#allocation7_spill] sm:$0xff] }
 0x21a   :  { %v1374_v47 = vmul.f32 %v2477_v24, %v1150_v26  ;;  %v1051_v0 = vadd.f32 %v1580_v60, %v2413_v5  ;;  %v1598_v24 = vadd.f32 %v2495_v22, %v2489_v7  ;;  %v1155_v15 = vmax.f32 %v1067_v23, 0.0 }
 0x21b   :  { %v1612_v52 = vpop.f32.mrf.mxu1  ;;  %v1088_v6 = vadd.f32 %v1607_v1, %v2431_v55  ;;  %v1091_v39 = vadd.f32 %v1610_v53, %v2604_v51 }
 0x21c   :  { %v1151_v17 = vmax.f32 %v1051_v0, 0.0  ;;  %v1405_v19 = vadd.f32 %v1404_v29, %v1374_v47  ;;  %v1075_v7 = vadd.f32 %v1598_v24, %v2425_v16  ;;  %v1379_v50 = vmul.f32 %v2505_v46, %v1155_v15  ;;  %v1319_v60 = vpop.permute.xlu1 %1318  ;;  %v1324_v61 = vpop.permute.xlu0 %1323  ;;  %v2607_v24 = vld [vmem:[#allocation9_spill] sm:$0xff] }
 0x21d   :  { %v1614_v9 = vpop.f32.mrf.mxu1  ;;  %v1613_v62 = vadd.f32 %v1612_v52, %v1611_v63  ;;  %v1160_v0 = vmax.f32 %v1088_v6, 0.0  ;;  %v1161_v14 = vmax.f32 %v1091_v39, 0.0 }
 0x21e   :  { %v1375_v5 = vmul.f32 %v2481_v31, %v1151_v17  ;;  %v1604_v31 = vadd.f32 %v2511_v37, %v2508_v30  ;;  %v1157_v16 = vmax.f32 %v1075_v7, 0.0  ;;  %v1380_v37 = vmul.f32 %v2513_v58, %v1156_v56  ;;  %v2606_v17 = vld [vmem:[#allocation8_spill] sm:$0xff] }
 0x21f   :  { %v1615_v32 = vpop.f32.mrf.mxu1  ;;  %v1382_v58 = vmul.f32 %v2527_v18, %v1158_v54  ;;  %v1096_v55 = vadd.f32 %v1613_v62, %v2605_v2  ;;  %v1385_v20 = vmul.f32 %v1304_v27, %v1161_v14  ;;  %v2611_v54 = vld [vmem:[#allocation13_spill] sm:$0xff] }
 0x220   :  { %v1406_v13 = vadd.f32 %v1405_v19, %v1375_v5  ;;  %v1083_v25 = vadd.f32 %v1604_v31, %v2429_v33  ;;  %v1381_v11 = vmul.f32 %v2518_v3, %v1157_v16  ;;  %v1616_v45 = vadd.f32 %v1615_v32, %v1614_v9  ;;  %v1329_v23 = vpop.permute.xlu1 %1328 }
 0x221   :  { %v1617_v48 = vpop.f32.mrf.mxu1  ;;  %v1384_v5 = vmul.f32 %v2545_v41, %v1160_v0  ;;  %v1162_v18 = vmax.f32 %v1096_v55, 0.0  ;;  %v2613_v55 = vld [vmem:[#allocation15_spill] sm:$0xff] }
 0x222   :  { %v1407_v22 = vadd.f32 %v1406_v13, %v1376_v38  ;;  %v1159_v35 = vmax.f32 %v1083_v25, 0.0  ;;  %v1099_v49 = vadd.f32 %v1616_v45, %v2606_v17  ;;  %v1334_v38 = vpop.permute.xlu0 %1333 }
 0x223   :  { %v1618_v59 = vpop.f32.mrf.mxu1  ;;  %v1386_v56 = vmul.f32 %v1309_v10, %v1162_v18 }
 0x224   :  { %v1408_v36 = vadd.f32 %v1407_v22, %v1377_v42  ;;  %v1619_v33 = vadd.f32 %v1618_v59, %v1617_v48  ;;  %v1383_v52 = vmul.f32 %v2535_v57, %v1159_v35  ;;  %v1163_v42 = vmax.f32 %v1099_v49, 0.0  ;;  %v2608_v48 = vld [vmem:[#allocation10_spill] sm:$0xff]  ;;  %v2609_v59 = vld [vmem:[#allocation11_spill] sm:$0xff]  ;;  %v1339_v1 = vpop.permute.xlu1 %1338 }
 0x225   :  { %v1620_v21 = vpop.f32.mrf.mxu1 }
 0x226   :  { %v1409_v30 = vadd.f32 %v1408_v36, %v1378_v40  ;;  %v1104_v9 = vadd.f32 %v1619_v33, %v2607_v24  ;;  %v1387_v53 = vmul.f32 %v1314_v8, %v1163_v42  ;;  %v809_v16 = vpop.permute.xlu0 %808 }
 0x227   :  { %v1621_v34 = vpop.f32.mrf.mxu1 }
 0x228   :  { %v1410_v26 = vadd.f32 %v1409_v30, %v1379_v50  ;;  %v1622_v3 = vadd.f32 %v1621_v34, %v1620_v21  ;;  %v1164_v7 = vmax.f32 %v1104_v9, 0.0  ;;  %v2610_v50 = vld [vmem:[#allocation12_spill] sm:$0xff]  ;;  %v1344_v35 = vpop.permute.xlu1 %1343 }
 0x229   :  { %v1623_v12 = vpop.f32.mrf.mxu1 }
 0x22a   :  { %v1411_v46 = vadd.f32 %v1410_v26, %v1380_v37  ;;  %v1107_v57 = vadd.f32 %v1622_v3, %v2608_v48  ;;  %v1388_v25 = vmul.f32 %v1319_v60, %v1164_v7 }
 0x22b   :  { %v1624_v47 = vpop.f32.mrf.mxu1 }
 0x22c   :  { %v1412_v28 = vadd.f32 %v1411_v46, %v1381_v11  ;;  %v1625_v32 = vadd.f32 %v1624_v47, %v1623_v12  ;;  %v1165_v21 = vmax.f32 %v1107_v57, 0.0  ;;  %v2612_v12 = vld [vmem:[#allocation14_spill] sm:$0xff]  ;;  %v1349_v17 = vpop.permute.xlu1 %1348 }
 0x22d   :  { %v1626_v63 = vpop.f32.mrf.mxu1 }
 0x22e   :  { %v1413_v29 = vadd.f32 %v1412_v28, %v1382_v58  ;;  %v1112_v40 = vadd.f32 %v1625_v32, %v2609_v59  ;;  %v1389_v51 = vmul.f32 %v1324_v61, %v1165_v21  ;;  %v814_v58 = vpop.permute.xlu0 %813 }
 0x22f   :  { %v1627_v19 = vpop.f32.mrf.mxu1 }
 0x230   :  { %v1414_v43 = vadd.f32 %v1413_v29, %v1383_v52  ;;  %v1628_v15 = vadd.f32 %v1627_v19, %v1626_v63  ;;  %v1166_v34 = vmax.f32 %v1112_v40, 0.0 }
 0x231   :  { %v1629_v4 = vpop.f32.mrf.mxu1 }
 0x232   :  { %v1415_v13 = vadd.f32 %v1414_v43, %v1384_v5  ;;  %v1115_v27 = vadd.f32 %v1628_v15, %v2610_v50  ;;  %v1390_v45 = vmul.f32 %v1329_v23, %v1166_v34  ;;  %v819_v23 = vpop.permute.xlu0 %818 }
 0x233   :  { %v1630_v31 = vpop.f32.mrf.mxu1 }
 0x234   :  { %v1416_v22 = vadd.f32 %v1415_v13, %v1385_v20  ;;  %v1631_v44 = vadd.f32 %v1630_v31, %v1629_v4  ;;  %v1167_v39 = vmax.f32 %v1115_v27, 0.0  ;;  %v1354_v13 = vpop.permute.xlu1 %1353 }
 0x235   :  { %v1632_v41 = vpop.f32.mrf.mxu1 }
 0x236   :  { %v1417_v36 = vadd.f32 %v1416_v22, %v1386_v56  ;;  %v1120_v6 = vadd.f32 %v1631_v44, %v2611_v54  ;;  %v1391_v28 = vmul.f32 %v1334_v38, %v1167_v39  ;;  %v1359_v31 = vpop.permute.xlu0 %1358 }
 0x237   :  { %v1633_v30 = vpop.f32.mrf.mxu1 }
 0x238   :  { %v1418_v37 = vadd.f32 %v1417_v36, %v1387_v53  ;;  %v1634_v26 = vadd.f32 %v1633_v30, %v1632_v41  ;;  %v1168_v33 = vmax.f32 %v1120_v6, 0.0  ;;  %v1364_v44 = vpop.permute.xlu1 %1363 }
 0x239   :  { %v1635_v62 = vpop.f32.mrf.mxu1 }
 0x23a   :  { %v1419_v10 = vadd.f32 %v1418_v37, %v1388_v25  ;;  %v1123_v11 = vadd.f32 %v1634_v26, %v2612_v12  ;;  %v1392_v29 = vmul.f32 %v1339_v1, %v1168_v33  ;;  %v1436_v25 = vstv %s2592_s6 }
 0x23b   :  { %v1636_v46 = vpop.f32.mrf.mxu1 }
 0x23c   :  { %v1420_v8 = vadd.f32 %v1419_v10, %v1389_v51  ;;  %v1637_v47 = vadd.f32 %v1636_v46, %v1635_v62  ;;  %v1169_v2 = vmax.f32 %v1123_v11, 0.0 }
 0x23d   :  { %v1638_v60 = vpop.f32.mrf.mxu1 }
 0x23e   :  { %v1421_v0 = vadd.f32 %v1420_v8, %v1390_v45  ;;  %v1128_v14 = vadd.f32 %v1637_v47, %v2613_v55  ;;  %v1393_v24 = vmul.f32 %v1344_v35, %v1169_v2 }
 0x23f   :  { %v1639_v63 = vpop.f32.mrf.mxu1 }
 0x240   :  { %v1422_v52 = vadd.f32 %v1421_v0, %v1391_v28  ;;  %v1640_v61 = vadd.f32 %v1639_v63, %v1638_v60  ;;  %v1170_v9 = vmax.f32 %v1128_v14, 0.0 }
 0x241   :  { %v1641_v49 = vpop.f32.mrf.mxu1 }
 0x242   :  { %v1423_v3 = vadd.f32 %v1422_v52, %v1392_v29  ;;  %v1131_v19 = vadd.f32 %v1640_v61, %v809_v16  ;;  %v1394_v38 = vmul.f32 %v1349_v17, %v1170_v9 }
 0x243   :  { %v1642_v5 = vpop.f32.mrf.mxu1 }
 0x244   :  { %v1424_v43 = vadd.f32 %v1423_v3, %v1393_v24  ;;  %v1171_v18 = vmax.f32 %v1131_v19, 0.0  ;;  %v1643_v32 = vadd.f32 %v1642_v5, %v1641_v49 }
 0x245   :  { %v1644_v20 = vpop.f32.mrf.mxu1 }
 0x246   :  { %v1136_v4 = vadd.f32 %v1643_v32, %v814_v58  ;;  %v1425_v48 = vadd.f32 %v1424_v43, %v1394_v38  ;;  %v1395_v57 = vmul.f32 %v1354_v13, %v1171_v18 }
 0x247   :  { %v1645_v42 = vpop.f32.mrf.mxu1 }
 0x248   :  { %v1172_v15 = vmax.f32 %v1136_v4, 0.0  ;;  %v1646_v7 = vadd.f32 %v1645_v42, %v1644_v20  ;;  %v1426_v59 = vadd.f32 %v1425_v48, %v1395_v57 }
 0x24a   :  { %v1396_v22 = vmul.f32 %v1359_v31, %v1172_v15  ;;  %v1139_v56 = vadd.f32 %v1646_v7, %v819_v23 }
 0x24c   :  { %v1173_v40 = vmax.f32 %v1139_v56, 0.0  ;;  %v1427_v1 = vadd.f32 %v1426_v59, %v1396_v22 }
 0x24e   :  { %v1397_v41 = vmul.f32 %v1364_v44, %v1173_v40 }
 0x250   :  { %v1428_v36 = vadd.f32 %v1427_v1, %v1397_v41 }
 0x252   :  { %v1429_v53 = vrot.slane %v1428_v36, 4 }
 0x254   :  { %v1430_v21 = vadd.f32 %v1429_v53, %v1428_v36 }
 0x256   :  { %v1431_v50 = vrot.slane %v1430_v21, 2 }
 0x258   :  { %v1432_v27 = vadd.f32 %v1431_v50, %v1430_v21 }
 0x25a   :  { %v1433_v16 = vrot.slane %v1432_v27, 1 }
 0x25c   :  { %v1434_v30 = vadd.f32 %v1433_v16, %v1432_v27 }
 0x25e   :  { %v1437_v37 = vadd.f32 %v1436_v25, %v1434_v30 }
 0x260   :  { %1438 = vst [vmem:[#allocation3] sm:$0x1] %v1437_v37 }
 0x261   :  { %1778 = shalt.err (!%p1775_p4)
}
 0x262   :  { %1448 = dma.vmem_to_hbm [thread:$0]  %s1446_s14, 16, %s2593_s7, [#allocation4]  }
 0x263   :  { %1787 = dma.done.wait [#allocation4], 16  }
 0x264   :  { %1788 = vsyncadd [#allocation4], 4294967280 }
 0x265   :  { %1452 = vsyncpa [#allocation4], 1 }

// kernel: tpu_custom_call.1
= control target key start
LH: loop header
LB: loop body
LE: loop exit
PB: predicated region body
PF: predicated region fallthrough
CT: control target
= control target key end

     0   :  { %v1789_v3 = vmov 0   ;;  %vm339_vm0 = vcmask 261120   ;;  %s2586_s0 = inlined_call_operand.vmem [shape: f32[32,128], index: 0, kind: input, shape index: {}]   ;;  %s2587_s1 = inlined_call_operand.vmem [shape: bf16[256,32], index: 1, kind: input, shape index: {}]   ;;  %s2588_s2 = inlined_call_operand.vmem [shape: f32[256,1], index: 2, kind: input, shape index: {}]   ;;  %s2589_s3 = inlined_call_operand.vmem [shape: bf16[256,256], index: 3, kind: input, shape index: {}]   ;;  %s2590_s4 = inlined_call_operand.vmem [shape: f32[256,1], index: 4, kind: input, shape index: {}]   ;;  %s2591_s5 = inlined_call_operand.vmem [shape: f32[256,1], index: 5, kind: input, shape index: {}]   ;;  %s2592_s6 = inlined_call_operand.<no memory space> [shape: f32[1,1], index: 6, kind: input, shape index: {}]   ;;  %s2593_s7 = inlined_call_operand.hbm [shape: f32[1,128], index: 7, kind: output, shape index: {}]  }
   0x1   :  { %v97_v0 = vld [vmem:[%s2588_s2 + $0xf0] sm:$0xff]  ;;  %1702 = vset.pattern.permute.xlu1 %v1789_v3  ;;  %1701 = vset.pattern.permute.xlu0 %v1789_v3  ;;  %v64_v4 = vld [vmem:[%s2586_s0 + $0x18] sm:$0xff]  ;;  %v61_v7 = vld [vmem:[%s2586_s0] sm:$0xff] }
   0x2   :  { %v81_v1 = vld [vmem:[%s2588_s2 + $0x70] sm:$0xff]  ;;  %251 = vperm.xlu0 %1701, %v97_v0   ;;  %v98_v6 = vld [vmem:[%s2588_s2 + $0xf8] sm:$0xff]  ;;  %v62_v8 = vld [vmem:[%s2586_s0 + $0x8] sm:$0xff] }
   0x3   :  { %v63_v2 = vld [vmem:[%s2586_s0 + $0x10] sm:$0xff]  ;;  %171 = vperm.xlu1 %1702, %v81_v1   ;;  %v82_v9 = vld [vmem:[%s2588_s2 + $0x78] sm:$0xff]  ;;  %v65_v10 = vpack.c.bf16 %v62_v8, %v61_v7  ;;  %v1703_v11 = vld [vmem:[%s2587_s1] sm:$0xff]  }
   0x4   :  { %v66_v5 = vpack.c.bf16 %v64_v4, %v63_v2  ;;  %v95_v12 = vld [vmem:[%s2588_s2 + $0xe0] sm:$0xff]  ;;  %v96_v13 = vld [vmem:[%s2588_s2 + $0xe8] sm:$0xff]  ;;  %1651 = vmatprep.mubr.msk.bf16.mxu0 %vm339_vm0, %v1703_v11  ;;  %v1705_v15 = vld [vmem:[%s2587_s1 + $0x10] sm:$0xff]  }
   0x5   :  { %v1704_v14 = vld [vmem:[%s2587_s1 + $0x8] sm:$0xff]   ;;  %v79_v17 = vld [vmem:[%s2588_s2 + $0x60] sm:$0xff]  ;;  %v94_v18 = vld [vmem:[%s2588_s2 + $0xd8] sm:$0xff] }
   0x6   :  { %1647 = vmatprep.subr.bf16.mxu0 %v66_v5  ;;  %256 = vperm.xlu0 %1701, %v98_v6   ;;  %v80_v16 = vld [vmem:[%s2588_s2 + $0x68] sm:$0xff]  ;;  %v93_v19 = vld [vmem:[%s2588_s2 + $0xd0] sm:$0xff]  ;;  %v1706_v20 = vld [vmem:[%s2587_s1 + $0x18] sm:$0xff]  }
   0x7   :  { %1648 = vmatpush3.bf16.msra.mxu0 %v66_v5  ;;  %176 = vperm.xlu1 %1702, %v82_v9   ;;  %v1707_v21 = vld [vmem:[%s2587_s1 + $0x20] sm:$0xff]   ;;  %v78_v22 = vld [vmem:[%s2588_s2 + $0x58] sm:$0xff]  ;;  %v77_v23 = vld [vmem:[%s2588_s2 + $0x50] sm:$0xff] }
   0x8   :  { %1649 = vmatprep.subr.bf16.mxu0 %v65_v10  ;;  %v92_v24 = vld [vmem:[%s2588_s2 + $0xc8] sm:$0xff]  ;;  %v91_v25 = vld [vmem:[%s2588_s2 + $0xc0] sm:$0xff]  ;;  %v1709_v27 = vld [vmem:[%s2587_s1 + $0x30] sm:$0xff]  }
   0x9   :  { %v1708_v26 = vld [vmem:[%s2587_s1 + $0x28] sm:$0xff]   ;;  %v75_v29 = vld [vmem:[%s2588_s2 + $0x40] sm:$0xff]  ;;  %v90_v30 = vld [vmem:[%s2588_s2 + $0xb8] sm:$0xff] }
   0xa   :  { %241 = vperm.xlu0 %1701, %v95_v12   ;;  %v76_v28 = vld [vmem:[%s2588_s2 + $0x48] sm:$0xff]  ;;  %v89_v31 = vld [vmem:[%s2588_s2 + $0xb0] sm:$0xff]  ;;  %v1710_v32 = vld [vmem:[%s2587_s1 + $0x38] sm:$0xff]  }
   0xb   :  { %1650 = vmatpush3.bf16.msra.mxu0 %v65_v10  ;;  %246 = vperm.xlu1 %1702, %v96_v13   ;;  %v1711_v33 = vld [vmem:[%s2587_s1 + $0x40] sm:$0xff]   ;;  %v74_v34 = vld [vmem:[%s2588_s2 + $0x38] sm:$0xff]  ;;  %v73_v35 = vld [vmem:[%s2588_s2 + $0x30] sm:$0xff] }
   0xc   :  { %v88_v36 = vld [vmem:[%s2588_s2 + $0xa8] sm:$0xff]  ;;  %v87_v37 = vld [vmem:[%s2588_s2 + $0xa0] sm:$0xff]  ;;  %v1713_v39 = vld [vmem:[%s2587_s1 + $0x50] sm:$0xff]  }
   0xd   :  { %v1712_v38 = vld [vmem:[%s2587_s1 + $0x48] sm:$0xff]   ;;  %v71_v41 = vld [vmem:[%s2588_s2 + $0x20] sm:$0xff]  ;;  %v86_v42 = vld [vmem:[%s2588_s2 + $0x98] sm:$0xff] }
   0xe   :  { %1652 = vmatmul.mubr.msk.bf16.vlgmr.msra.gmra.mxu0 %vm339_vm0, %v1704_v14  ;;  %161 = vperm.xlu0 %1701, %v79_v17   ;;  %v72_v40 = vld [vmem:[%s2588_s2 + $0x28] sm:$0xff]  ;;  %v85_v43 = vld [vmem:[%s2588_s2 + $0x90] sm:$0xff]  ;;  %v1714_v44 = vld [vmem:[%s2587_s1 + $0x58] sm:$0xff]  }
   0xf   :  { %1655 = vmatprep.mubr.msk.bf16.mxu0 %vm339_vm0, %v1705_v15  ;;  %166 = vperm.xlu1 %1702, %v80_v16   ;;  %v70_v45 = vld [vmem:[%s2588_s2 + $0x18] sm:$0xff]  ;;  %v1715_v46 = vld [vmem:[%s2587_s1 + $0x60] sm:$0xff]   ;;  %v69_v47 = vld [vmem:[%s2588_s2 + $0x10] sm:$0xff] }
  0x10   :  { %v84_v48 = vld [vmem:[%s2588_s2 + $0x88] sm:$0xff]  ;;  %v83_v49 = vld [vmem:[%s2588_s2 + $0x80] sm:$0xff]  ;;  %v1717_v51 = vld [vmem:[%s2587_s1 + $0x70] sm:$0xff]  }
  0x11   :  { %v1716_v50 = vld [vmem:[%s2587_s1 + $0x68] sm:$0xff]   ;;  %v67_v53 = vld [vmem:[%s2588_s2] sm:$0xff] }
  0x12   :  { %231 = vperm.xlu0 %1701, %v93_v19   ;;  %v68_v52 = vld [vmem:[%s2588_s2 + $0x8] sm:$0xff] }
  0x13   :  { %236 = vperm.xlu1 %1702, %v94_v18  }
  0x16   :  { %1656 = vmatmul.mubr.msk.bf16.gmra.mxu0 %vm339_vm0, %v1706_v20  ;;  %151 = vperm.xlu0 %1701, %v77_v23  }
  0x17   :  { %1659 = vmatprep.mubr.msk.bf16.mxu0 %vm339_vm0, %v1707_v21  ;;  %156 = vperm.xlu1 %1702, %v78_v22  }
  0x1a   :  { %221 = vperm.xlu0 %1701, %v91_v25  }
  0x1b   :  { %226 = vperm.xlu1 %1702, %v92_v24  }
  0x1e   :  { %1660 = vmatmul.mubr.msk.bf16.gmra.mxu0 %vm339_vm0, %v1708_v26  ;;  %141 = vperm.xlu0 %1701, %v75_v29  }
  0x1f   :  { %1663 = vmatprep.mubr.msk.bf16.mxu0 %vm339_vm0, %v1709_v27  ;;  %146 = vperm.xlu1 %1702, %v76_v28  }
  0x22   :  { %211 = vperm.xlu0 %1701, %v89_v31  }
  0x23   :  { %216 = vperm.xlu1 %1702, %v90_v30  }
  0x26   :  { %1664 = vmatmul.mubr.msk.bf16.gmra.mxu0 %vm339_vm0, %v1710_v32  ;;  %131 = vperm.xlu0 %1701, %v73_v35  }
  0x27   :  { %1667 = vmatprep.mubr.msk.bf16.mxu0 %vm339_vm0, %v1711_v33  ;;  %136 = vperm.xlu1 %1702, %v74_v34  }
  0x2a   :  { %201 = vperm.xlu0 %1701, %v87_v37  }
  0x2b   :  { %206 = vperm.xlu1 %1702, %v88_v36  }
  0x2e   :  { %1668 = vmatmul.mubr.msk.bf16.gmra.mxu0 %vm339_vm0, %v1712_v38  ;;  %121 = vperm.xlu0 %1701, %v71_v41  }
  0x2f   :  { %1671 = vmatprep.mubr.msk.bf16.mxu0 %vm339_vm0, %v1713_v39  ;;  %126 = vperm.xlu1 %1702, %v72_v40  }
  0x32   :  { %191 = vperm.xlu0 %1701, %v85_v43  }
  0x33   :  { %196 = vperm.xlu1 %1702, %v86_v42  }
  0x36   :  { %1672 = vmatmul.mubr.msk.bf16.gmra.mxu0 %vm339_vm0, %v1714_v44  ;;  %111 = vperm.xlu0 %1701, %v69_v47  }
  0x37   :  { %1675 = vmatprep.mubr.msk.bf16.mxu0 %vm339_vm0, %v1715_v46  ;;  %116 = vperm.xlu1 %1702, %v70_v45  }
  0x3a   :  { %181 = vperm.xlu0 %1701, %v83_v49  }
  0x3b   :  { %186 = vperm.xlu1 %1702, %v84_v48  }
  0x3c   :  { %13 = vsyncpa [#allocation4], 0  ;;  %v630_v54 = vld [vmem:[%s2590_s4 + $0x8] sm:$0xff]  ;;  %v629_v55 = vld [vmem:[%s2590_s4] sm:$0xff]  ;;  %s1790_s13 = smov [#allocation3]  }
  0x3d   :  { %v1718_v56 = vld [vmem:[%s2587_s1 + $0x78] sm:$0xff]   ;;  %v631_v58 = vld [vmem:[%s2590_s4 + $0x10] sm:$0xff]  ;;  %v634_v59 = vld [vmem:[%s2590_s4 + $0x28] sm:$0xff]  ;;  %s1445_s14 = sshll.u32 %s1790_s13, 4  ;;  %s1446_s14 = int_to_ptr.vmem [resolvable:$true] %s1445_s14 }
  0x3e   :  { %1676 = vmatmul.mubr.msk.bf16.gmra.mxu0 %vm339_vm0, %v1716_v50  ;;  %101 = vperm.xlu0 %1701, %v67_v53   ;;  %v632_v57 = vld [vmem:[%s2590_s4 + $0x18] sm:$0xff]  ;;  %v633_v60 = vld [vmem:[%s2590_s4 + $0x20] sm:$0xff]  ;;  %v635_v62 = vld [vmem:[%s2590_s4 + $0x30] sm:$0xff]  ;;  %s1767_s15 = scalar_lea.vmem %s1446_s14, 16  ;;  %s1771_s16 = scalar_lea.vmem %s1446_s14, 32 }
  0x3f   :  { %1679 = vmatprep.mubr.msk.bf16.mxu0 %vm339_vm0, %v1717_v51  ;;  %106 = vperm.xlu1 %1702, %v68_v52   ;;  %v636_v61 = vld [vmem:[%s2590_s4 + $0x38] sm:$0xff]  ;;  %v638_v63 = vld [vmem:[%s2590_s4 + $0x48] sm:$0xff]  ;;  %v637_v0 = vld [vmem:[%s2590_s4 + $0x40] sm:$0xff]  ;;  %p1768_p0 = scmp.ne.s32.totalorder %s1446_s14, %s1767_s15  ;;  %p1772_p1 = scmp.lt.s32.totalorder %s1446_s14, %s1446_s14 }
  0x40   :  { %v640_v1 = vld [vmem:[%s2590_s4 + $0x58] sm:$0xff]  ;;  %v639_v2 = vld [vmem:[%s2590_s4 + $0x50] sm:$0xff]  ;;  %v642_v3 = vld [vmem:[%s2590_s4 + $0x68] sm:$0xff]  ;;  %p1773_p2 = scmp.lt.s32.totalorder %s1771_s16, %s1767_s15 }
  0x41   :  { %v641_v4 = vld [vmem:[%s2590_s4 + $0x60] sm:$0xff]  ;;  %v644_v5 = vld [vmem:[%s2590_s4 + $0x78] sm:$0xff]  ;;  %v643_v6 = vld [vmem:[%s2590_s4 + $0x70] sm:$0xff] }
  0x42   :  { %663 = vperm.xlu0 %1701, %v629_v55   ;;  %v646_v7 = vld [vmem:[%s2590_s4 + $0x88] sm:$0xff]  ;;  %v645_v8 = vld [vmem:[%s2590_s4 + $0x80] sm:$0xff]  ;;  %v648_v9 = vld [vmem:[%s2590_s4 + $0x98] sm:$0xff]  ;;  %p1774_p3 = por %p1773_p2, %p1772_p1 }
  0x43   :  { %668 = vperm.xlu1 %1702, %v630_v54   ;;  %v647_v10 = vld [vmem:[%s2590_s4 + $0x90] sm:$0xff]  ;;  %v650_v11 = vld [vmem:[%s2590_s4 + $0xa8] sm:$0xff]  ;;  %v649_v12 = vld [vmem:[%s2590_s4 + $0xa0] sm:$0xff] }
  0x44   :  { %v652_v13 = vld [vmem:[%s2590_s4 + $0xb8] sm:$0xff]  ;;  %v651_v14 = vld [vmem:[%s2590_s4 + $0xb0] sm:$0xff]  ;;  %v654_v15 = vld [vmem:[%s2590_s4 + $0xc8] sm:$0xff]  ;;  %p1775_p4 = pnand %p1774_p3, %p1768_p0 }
  0x45   :  { %v653_v16 = vld [vmem:[%s2590_s4 + $0xc0] sm:$0xff]  ;;  %v656_v17 = vld [vmem:[%s2590_s4 + $0xd8] sm:$0xff]  ;;  %v655_v18 = vld [vmem:[%s2590_s4 + $0xd0] sm:$0xff] }
  0x46   :  { %1680 = vmatmul.mubr.msk.bf16.gmra.mxu0 %vm339_vm0, %v1718_v56  ;;  %673 = vperm.xlu0 %1701, %v631_v58   ;;  %v1174_v19 = vld [vmem:[%s2591_s5] sm:$0xff]  ;;  %v1176_v21 = vld [vmem:[%s2591_s5 + $0x10] sm:$0xff]  ;;  %v1175_v22 = vld [vmem:[%s2591_s5 + $0x8] sm:$0xff] }
  0x47   :  { %678 = vperm.xlu1 %1702, %v632_v57   ;;  %v657_v20 = vld [vmem:[%s2590_s4 + $0xe0] sm:$0xff]  ;;  %v1177_v26 = vld [vmem:[%s2591_s5 + $0x18] sm:$0xff]  ;;  %v1180_v29 = vld [vmem:[%s2591_s5 + $0x30] sm:$0xff] }
  0x48   :  { %v1178_v25 = vld [vmem:[%s2591_s5 + $0x20] sm:$0xff]  ;;  %v1179_v30 = vld [vmem:[%s2591_s5 + $0x28] sm:$0xff]  ;;  %v1181_v34 = vld [vmem:[%s2591_s5 + $0x38] sm:$0xff] }
  0x49   :  { %v1182_v33 = vld [vmem:[%s2591_s5 + $0x40] sm:$0xff]  ;;  %v1184_v37 = vld [vmem:[%s2591_s5 + $0x50] sm:$0xff]  ;;  %v1183_v38 = vld [vmem:[%s2591_s5 + $0x48] sm:$0xff] }
  0x4a   :  { %683 = vperm.xlu0 %1701, %v633_v60   ;;  %v1186_v40 = vld [vmem:[%s2591_s5 + $0x60] sm:$0xff]  ;;  %v1185_v41 = vld [vmem:[%s2591_s5 + $0x58] sm:$0xff]  ;;  %v1188_v43 = vld [vmem:[%s2591_s5 + $0x70] sm:$0xff] }
  0x4b   :  { %688 = vperm.xlu1 %1702, %v634_v59   ;;  %v1187_v44 = vld [vmem:[%s2591_s5 + $0x68] sm:$0xff]  ;;  %v1190_v47 = vld [vmem:[%s2591_s5 + $0x80] sm:$0xff]  ;;  %v1189_v48 = vld [vmem:[%s2591_s5 + $0x78] sm:$0xff] }
  0x4c   :  { %v1192_v50 = vld [vmem:[%s2591_s5 + $0x90] sm:$0xff]  ;;  %v1191_v51 = vld [vmem:[%s2591_s5 + $0x88] sm:$0xff]  ;;  %v1194_v53 = vld [vmem:[%s2591_s5 + $0xa0] sm:$0xff] }
  0x4d   :  { %v1193_v54 = vld [vmem:[%s2591_s5 + $0x98] sm:$0xff]  ;;  %v1196_v57 = vld [vmem:[%s2591_s5 + $0xb0] sm:$0xff]  ;;  %v1195_v58 = vld [vmem:[%s2591_s5 + $0xa8] sm:$0xff] }
  0x4e   :  { %693 = vperm.xlu0 %1701, %v635_v62   ;;  %v1198_v60 = vld [vmem:[%s2591_s5 + $0xc0] sm:$0xff] }
  0x4f   :  { %698 = vperm.xlu1 %1702, %v636_v61   ;;  %v1197_v61 = vld [vmem:[%s2591_s5 + $0xb8] sm:$0xff] }
  0x52   :  { %703 = vperm.xlu0 %1701, %v637_v0   ;;  %v1199_v0 = vld [vmem:[%s2591_s5 + $0xc8] sm:$0xff] }
  0x53   :  { %708 = vperm.xlu1 %1702, %v638_v63   ;;  %v1200_v63 = vld [vmem:[%s2591_s5 + $0xd0] sm:$0xff] }
  0x56   :  { %713 = vperm.xlu0 %1701, %v639_v2   ;;  %v1721_v2 = vld [vmem:[%s2589_s3 + $0x54] ss:$8 sps:$4 sm:$0xff]  }
  0x57   :  { %718 = vperm.xlu1 %1702, %v640_v1   ;;  %1053 = vmatprep.mubr.bf16.mxu1 %v1721_v2 }
  0x5a   :  { %723 = vperm.xlu0 %1701, %v641_v4  }
  0x5b   :  { %728 = vperm.xlu1 %1702, %v642_v3   ;;  %v1724_v3 = vld [vmem:[%s2589_s3 + $0x4] ss:$8 sps:$4 sm:$0xff]  }
  0x5c   :  { %1013 = vmatprep.mubr.bf16.mxu0 %v1724_v3 }
  0x5e   :  { %733 = vperm.xlu0 %1701, %v643_v6   ;;  %v658_v6 = vld [vmem:[%s2590_s4 + $0xe8] sm:$0xff] }
  0x5f   :  { %738 = vperm.xlu1 %1702, %v644_v5   ;;  %v1201_v5 = vld [vmem:[%s2591_s5 + $0xd8] sm:$0xff] }
  0x62   :  { %743 = vperm.xlu0 %1701, %v645_v8   ;;  %v1202_v8 = vld [vmem:[%s2591_s5 + $0xe0] sm:$0xff] }
  0x63   :  { %748 = vperm.xlu1 %1702, %v646_v7  }
  0x66   :  { %753 = vperm.xlu0 %1701, %v647_v10  }
  0x67   :  { %758 = vperm.xlu1 %1702, %v648_v9   ;;  %v659_v9 = vld [vmem:[%s2590_s4 + $0xf0] sm:$0xff] }
  0x6a   :  { %763 = vperm.xlu0 %1701, %v649_v12   ;;  %v660_v12 = vld [vmem:[%s2590_s4 + $0xf8] sm:$0xff] }
  0x6b   :  { %768 = vperm.xlu1 %1702, %v650_v11   ;;  %v1203_v11 = vld [vmem:[%s2591_s5 + $0xe8] sm:$0xff] }
  0x6e   :  { %773 = vperm.xlu0 %1701, %v651_v14  }
  0x6f   :  { %778 = vperm.xlu1 %1702, %v652_v13  }
  0x72   :  { %783 = vperm.xlu0 %1701, %v653_v16   ;;  %v1204_v16 = vld [vmem:[%s2591_s5 + $0xf0] sm:$0xff] }
  0x73   :  { %788 = vperm.xlu1 %1702, %v654_v15   ;;  %v1205_v15 = vld [vmem:[%s2591_s5 + $0xf8] sm:$0xff] }
  0x76   :  { %793 = vperm.xlu0 %1701, %v655_v18  }
  0x77   :  { %798 = vperm.xlu1 %1702, %v656_v17  }
  0x7a   :  { %803 = vperm.xlu0 %1701, %v657_v20  }
  0x7b   :  { %1208 = vperm.xlu1 %1702, %v1174_v19  }
  0x7d   :  { %v2099_v23 = vpop.permute.xlu0 %251 }
  0x7e   :  { %v2101_v24 = vpop.permute.xlu1 %171  ;;  %1213 = vperm.xlu0 %1701, %v1175_v22  }
  0x7f   :  { %1218 = vperm.xlu1 %1702, %v1176_v21  }
  0x81   :  { %v2109_v27 = vpop.permute.xlu0 %256 }
  0x82   :  { %v2111_v28 = vpop.permute.xlu1 %176  ;;  %1223 = vperm.xlu0 %1701, %v1177_v26  }
  0x83   :  { %1228 = vperm.xlu1 %1702, %v1178_v25  }
  0x85   :  { %v2119_v31 = vpop.permute.xlu0 %241 }
  0x86   :  { %v2121_v32 = vpop.permute.xlu1 %246  ;;  %1233 = vperm.xlu0 %1701, %v1179_v30  }
  0x87   :  { %1238 = vperm.xlu1 %1702, %v1180_v29  }
  0x89   :  { %v2129_v35 = vpop.permute.xlu0 %161 }
  0x8a   :  { %v2131_v36 = vpop.permute.xlu1 %166  ;;  %1243 = vperm.xlu0 %1701, %v1181_v34  }
  0x8b   :  { %1248 = vperm.xlu1 %1702, %v1182_v33  }
  0x8d   :  { %v2139_v39 = vpop.permute.xlu0 %231 }
  0x8e   :  { %1253 = vperm.xlu0 %1701, %v1183_v38   ;;  %v2147_v42 = vpop.permute.xlu1 %236 }
  0x8f   :  { %1258 = vperm.xlu1 %1702, %v1184_v37  }
  0x91   :  { %v2155_v45 = vpop.permute.xlu0 %151 }
  0x92   :  { %1263 = vperm.xlu0 %1701, %v1185_v41   ;;  %v2157_v46 = vpop.permute.xlu1 %156 }
  0x93   :  { %1268 = vperm.xlu1 %1702, %v1186_v40  }
  0x95   :  { %v2165_v49 = vpop.permute.xlu0 %221 }
  0x96   :  { %1273 = vperm.xlu0 %1701, %v1187_v44   ;;  %v2173_v52 = vpop.permute.xlu1 %226 }
  0x97   :  { %1278 = vperm.xlu1 %1702, %v1188_v43  }
  0x99   :  { %v2181_v55 = vpop.permute.xlu0 %141 }
  0x9a   :  { %1283 = vperm.xlu0 %1701, %v1189_v48   ;;  %v2183_v56 = vpop.permute.xlu1 %146 }
  0x9b   :  { %1288 = vperm.xlu1 %1702, %v1190_v47  }
  0x9d   :  { %v2191_v59 = vpop.permute.xlu0 %211 }
  0x9e   :  { %1293 = vperm.xlu0 %1701, %v1191_v51   ;;  %v2199_v62 = vpop.permute.xlu1 %216 }
  0x9f   :  { %1298 = vperm.xlu1 %1702, %v1192_v50  }
  0xa1   :  { %v132_v1 = vpop.permute.xlu0 %131 }
  0xa2   :  { %1303 = vperm.xlu0 %1701, %v1193_v54   ;;  %v137_v4 = vpop.permute.xlu1 %136 }
  0xa3   :  { %1308 = vperm.xlu1 %1702, %v1194_v53  }
  0xa5   :  { %v2219_v7 = vpop.permute.xlu0 %201 }
  0xa6   :  { %1313 = vperm.xlu0 %1701, %v1195_v58   ;;  %v2227_v10 = vpop.permute.xlu1 %206 }
  0xa7   :  { %1318 = vperm.xlu1 %1702, %v1196_v57  }
  0xa9   :  { %v122_v13 = vpop.permute.xlu0 %121 }
  0xaa   :  { %1323 = vperm.xlu0 %1701, %v1197_v61   ;;  %v127_v14 = vpop.permute.xlu1 %126 }
  0xab   :  { %1328 = vperm.xlu1 %1702, %v1198_v60  }
  0xad   :  { %v2241_v17 = vpop.permute.xlu0 %191 }
  0xae   :  { %1333 = vperm.xlu0 %1701, %v1199_v0   ;;  %v2243_v18 = vpop.permute.xlu1 %196 }
  0xaf   :  { %1338 = vperm.xlu1 %1702, %v1200_v63  }
  0xb1   :  { %v112_v19 = vpop.permute.xlu0 %111 }
  0xb2   :  { %808 = vperm.xlu0 %1701, %v658_v6   ;;  %v117_v20 = vpop.permute.xlu1 %116 }
  0xb3   :  { %1343 = vperm.xlu1 %1702, %v1201_v5  }
  0xb5   :  { %v2245_v21 = vpop.permute.xlu0 %181 }
  0xb6   :  { %813 = vperm.xlu0 %1701, %v659_v9   ;;  %v2247_v22 = vpop.permute.xlu1 %186 }
  0xb7   :  { %1348 = vperm.xlu1 %1702, %v1202_v8  }
  0xb9   :  { %v102_v30 = vpop.permute.xlu0 %101 }
  0xba   :  { %818 = vperm.xlu0 %1701, %v660_v12   ;;  %v107_v38 = vpop.permute.xlu1 %106 }
  0xbb   :  { %1353 = vperm.xlu1 %1702, %v1203_v11  }
  0xbe   :  { %1358 = vperm.xlu0 %1701, %v1204_v16  }
  0xbf   :  { %1363 = vperm.xlu1 %1702, %v1205_v15  }
  0xce   :  { %v1653_v25 = vpop.f32.mrf.mxu0 }
  0xcf   :  { %v431_v29 = vadd.f32 %v1653_v25, %v112_v19 }
  0xd0   :  { %v422_v26 = vpop.f32.mrf.mxu0 }
  0xd1   :  { %v423_v34 = vadd.f32 %v422_v26, %v102_v30  ;;  %v551_v41 = vmax.f32 %v431_v29, 0.0 }
  0xd2   :  { %v1654_v33 = vpop.f32.mrf.mxu0 }
  0xd3   :  { %v434_v37 = vadd.f32 %v1654_v33, %v117_v20  ;;  %v549_v48 = vmax.f32 %v423_v34, 0.0 }
  0xd4   :  { %v425_v40 = vpop.f32.mrf.mxu0 }
  0xd5   :  { %v552_v43 = vmax.f32 %v434_v37, 0.0  ;;  %v426_v44 = vadd.f32 %v425_v40, %v107_v38 }
  0xd6   :  { %v1657_v47 = vpop.f32.mrf.mxu0 }
  0xd7   :  { %v2249_v50 = vpack.c.bf16 %v552_v43, %v551_v41  ;;  %v550_v51 = vmax.f32 %v426_v44, 0.0  ;;  %v447_v57 = vadd.f32 %v1657_v47, %v132_v1 }
  0xd8   :  { %v438_v53 = vpop.f32.mrf.mxu0 }
  0xd9   :  { %v2251_v54 = vpack.c.bf16 %v550_v51, %v549_v48  ;;  %v439_v60 = vadd.f32 %v438_v53, %v122_v13  ;;  %v555_v0 = vmax.f32 %v447_v57, 0.0 }
  0xda   :  { %v1658_v58 = vpop.f32.mrf.mxu0 }
  0xdb   :  { %v450_v61 = vadd.f32 %v1658_v58, %v137_v4  ;;  %v553_v6 = vmax.f32 %v439_v60, 0.0 }
  0xdc   :  { %v441_v63 = vpop.f32.mrf.mxu0 }
  0xdd   :  { %v556_v2 = vmax.f32 %v450_v61, 0.0  ;;  %v442_v3 = vadd.f32 %v441_v63, %v127_v14 }
  0xde   :  { %v1661_v5 = vpop.f32.mrf.mxu0 }
  0xdf   :  { %v2253_v8 = vpack.c.bf16 %v556_v2, %v555_v0  ;;  %v554_v9 = vmax.f32 %v442_v3, 0.0 }
  0xe0   :  { %v2255_v11 = vpop.f32.mrf.mxu0 }
  0xe1   :  { %v2257_v12 = vpack.c.bf16 %v554_v9, %v553_v6 }
  0xe2   :  { %v1662_v15 = vpop.f32.mrf.mxu0 }
  0xe4   :  { %v457_v16 = vpop.f32.mrf.mxu0 }
  0xe6   :  { %v1665_v19 = vpop.f32.mrf.mxu0 }
  0xe7   :  { %v479_v51 = vadd.f32 %v1665_v19, %v2101_v24 }
  0xe8   :  { %v470_v1 = vpop.f32.mrf.mxu0 }
  0xe9   :  { %v563_v6 = vmax.f32 %v479_v51, 0.0 }
  0xea   :  { %v1666_v20 = vpop.f32.mrf.mxu0 }
  0xeb   :  { %v482_v44 = vadd.f32 %v1666_v20, %v2111_v28 }
  0xec   :  { %v473_v13 = vpop.f32.mrf.mxu0 }
  0xed   :  { %v564_v60 = vmax.f32 %v482_v44, 0.0  ;;  %v474_v61 = vadd.f32 %v473_v13, %v2131_v36 }
  0xee   :  { %v2259_v4 = vpop.f32.mrf.mxu0 }
  0xef   :  { %v620_v20 = vpack.c.bf16 %v564_v60, %v563_v6  ;;  %v1735_v60 = vld [vmem:[%s2589_s3 + $0x20] ss:$8 sps:$4 sm:$0xff]   ;;  %v1745_v6 = vld [vmem:[%s2589_s3 + $0x94] ss:$8 sps:$4 sm:$0xff]  }
  0xf0   :  { %v2261_v25 = vpop.f32.mrf.mxu0 }
  0xf2   :  { %v2263_v14 = vpop.f32.mrf.mxu0 }
  0xf4   :  { %v2265_v26 = vpop.f32.mrf.mxu0 }
  0xf6   :  { %v1673_v29 = vpop.f32.mrf.mxu0 }
  0xf8   :  { %v2267_v30 = vpop.f32.mrf.mxu0 }
  0xfa   :  { %v1674_v33 = vpop.f32.mrf.mxu0 }
  0xfc   :  { %v505_v34 = vpop.f32.mrf.mxu0 }
  0xfe   :  { %v1677_v37 = vpop.f32.mrf.mxu0 }
  0xff   :  { %v527_v24 = vadd.f32 %v1677_v37, %v2139_v39  ;;  %v514_v37 = vadd.f32 %v1674_v33, %v2199_v62 }
 0x100   :  { %v518_v38 = vpop.f32.mrf.mxu0 }
 0x101   :  { %v519_v39 = vadd.f32 %v518_v38, %v2165_v49 }
 0x102   :  { %v1678_v40 = vpop.f32.mrf.mxu0 }
 0x103   :  { %v530_v0 = vadd.f32 %v1678_v40, %v2147_v42 }
 0x104   :  { %v521_v41 = vpop.f32.mrf.mxu0 }
 0x105   :  { %v576_v36 = vmax.f32 %v530_v0, 0.0  ;;  %v522_v13 = vadd.f32 %v521_v41, %v2173_v52  ;;  %v1739_v0 = vld [vmem:[%s2589_s3 + $0x84] ss:$8 sps:$4 sm:$0xff]  }
 0x106   :  { %v1681_v43 = vpop.f32.mrf.mxu0 }
 0x107   :  { %v543_v48 = vadd.f32 %v1681_v43, %v2099_v23  ;;  %v471_v23 = vadd.f32 %v470_v1, %v2129_v35  ;;  %v562_v43 = vmax.f32 %v474_v61, 0.0  ;;  %v575_v35 = vmax.f32 %v527_v24, 0.0  ;;  %v1736_v61 = vld [vmem:[%s2589_s3 + $0x70] ss:$8 sps:$4 sm:$0xff]  }
 0x108   :  { %v534_v47 = vpop.f32.mrf.mxu0  ;;  %v574_v41 = vmax.f32 %v522_v13, 0.0  ;;  %v1748_v24 = vld [vmem:[%s2589_s3 + $0x90] ss:$8 sps:$4 sm:$0xff]  }
 0x109   :  { %v535_v57 = vadd.f32 %v534_v47, %v2119_v31  ;;  %v579_v2 = vmax.f32 %v543_v48, 0.0  ;;  %v561_v40 = vmax.f32 %v471_v23, 0.0  ;;  %v626_v52 = vpack.c.bf16 %v576_v36, %v575_v35  ;;  %v1747_v23 = vld [vmem:[%s2589_s3 + $0x40] ss:$8 sps:$4 sm:$0xff]   ;;  %v1758_v36 = vld [vmem:[%s2589_s3 + $0xd4] ss:$8 sps:$4 sm:$0xff]  }
 0x10a   :  { %v1682_v53 = vpop.f32.mrf.mxu0  ;;  %v573_v47 = vmax.f32 %v519_v39, 0.0  ;;  %v572_v48 = vmax.f32 %v514_v37, 0.0  ;;  %v1760_v13 = vld [vmem:[%s2589_s3 + $0xd0] ss:$8 sps:$4 sm:$0xff]   ;;  %v2397_v39 = vpop.permute.xlu0 %663 }
 0x10b   :  { %v546_v58 = vadd.f32 %v1682_v53, %v2109_v27  ;;  %v577_v9 = vmax.f32 %v535_v57, 0.0  ;;  %v466_v27 = vadd.f32 %v1662_v15, %v2157_v46  ;;  %v458_v46 = vadd.f32 %v457_v16, %v2183_v56  ;;  %v1766_v35 = vld [vmem:[%s2589_s3 + $0xf0] ss:$8 sps:$4 sm:$0xff]  }
 0x10c   :  { %v537_v63 = vpop.f32.mrf.mxu0  ;;  %v619_v15 = vpack.c.bf16 %v562_v43, %v561_v40  ;;  %v506_v56 = vadd.f32 %v505_v34, %v2227_v10  ;;  %v625_v16 = vpack.c.bf16 %v574_v41, %v573_v47  ;;  %v495_v10 = vadd.f32 %v2259_v4, %v2241_v17  ;;  %v1757_v43 = vld [vmem:[%s2589_s3 + $0xc0] ss:$8 sps:$4 sm:$0xff]   ;;  %v1764_v40 = vld [vmem:[%s2589_s3 + $0xf4] ss:$8 sps:$4 sm:$0xff]  }
 0x10d   :  { %v580_v3 = vmax.f32 %v546_v58, 0.0  ;;  %v538_v28 = vadd.f32 %v537_v63, %v2121_v32  ;;  %v463_v32 = vadd.f32 %v1661_v5, %v2155_v45  ;;  %v560_v1 = vmax.f32 %v466_v27, 0.0  ;;  %v1733_v58 = vld [vmem:[%s2589_s3 + $0x74] ss:$8 sps:$4 sm:$0xff]   ;;  %v1754_v27 = vld [vmem:[%s2589_s3 + $0xb0] ss:$8 sps:$4 sm:$0xff]  }
 0x10e   :  { %v455_v45 = vadd.f32 %v2255_v11, %v2181_v55  ;;  %v511_v5 = vadd.f32 %v1673_v29, %v2191_v59  ;;  %v558_v38 = vmax.f32 %v458_v46, 0.0  ;;  %v503_v55 = vadd.f32 %v2267_v30, %v2219_v7  ;;  %v1737_v63 = vld [vmem:[%s2589_s3 + $0x34] ss:$8 sps:$4 sm:$0xff]   ;;  %v2399_v46 = vpop.permute.xlu0 %673 }
 0x10f   :  { %v628_v19 = vpack.c.bf16 %v580_v3, %v579_v2  ;;  %v578_v31 = vmax.f32 %v538_v28, 0.0  ;;  %v559_v44 = vmax.f32 %v463_v32, 0.0  ;;  %v498_v59 = vadd.f32 %v2263_v14, %v2243_v18  ;;  %v1741_v2 = vld [vmem:[%s2589_s3 + $0x30] ss:$8 sps:$4 sm:$0xff]   ;;  %v1742_v3 = vld [vmem:[%s2589_s3 + $0x80] ss:$8 sps:$4 sm:$0xff]  }
 0x110   :  { %v557_v62 = vmax.f32 %v455_v45, 0.0  ;;  %v571_v33 = vmax.f32 %v511_v5, 0.0  ;;  %v570_v51 = vmax.f32 %v506_v56, 0.0  ;;  %v569_v34 = vmax.f32 %v503_v55, 0.0  ;;  %v1743_v28 = vld [vmem:[%s2589_s3 + $0x44] ss:$8 sps:$4 sm:$0xff]  }
 0x111   :  { %v627_v42 = vpack.c.bf16 %v578_v31, %v577_v9  ;;  %1535 = vmatprep.subr.bf16.mxu0 %v628_v19  ;;  %1683 = vmatprep.subr.bf16.mxu1 %v628_v19  ;;  %v618_v49 = vpack.c.bf16 %v560_v1, %v559_v44  ;;  %v568_v53 = vmax.f32 %v498_v59, 0.0  ;;  %v490_v7 = vadd.f32 %v2265_v26, %v2247_v22  ;;  %v1731_v26 = vld [vmem:[%s2589_s3 + $0x24] ss:$8 sps:$4 sm:$0xff]   ;;  %v1751_v19 = vld [vmem:[%s2589_s3 + $0xa0] ss:$8 sps:$4 sm:$0xff]   ;;  %v669_v1 = vpop.permute.xlu1 %668 }
 0x112   :  { %1536 = vmatpush3.bf16.msra.mxu0 %v620_v20  ;;  %1691 = vmatpush3.bf16.msra.mxu1 %v620_v20  ;;  %v617_v11 = vpack.c.bf16 %v558_v38, %v557_v62  ;;  %v624_v29 = vpack.c.bf16 %v572_v48, %v571_v33  ;;  %v623_v30 = vpack.c.bf16 %v570_v51, %v569_v34  ;;  %v567_v18 = vmax.f32 %v495_v10, 0.0  ;;  %v1749_v9 = vld [vmem:[%s2589_s3 + $0xa4] ss:$8 sps:$4 sm:$0xff]   ;;  %v1752_v31 = vld [vmem:[%s2589_s3 + $0xb4] ss:$8 sps:$4 sm:$0xff]   ;;  %v2403_v37 = vpop.permute.xlu0 %683 }
 0x113   :  { %1537 = vmatprep.subr.bf16.mxu0 %v627_v42  ;;  %1684 = vmatprep.subr.bf16.mxu1 %v627_v42  ;;  %v487_v14 = vadd.f32 %v2261_v25, %v2245_v21  ;;  %v566_v17 = vmax.f32 %v490_v7, 0.0  ;;  %v1719_v21 = vld [vmem:[%s2589_s3 + $0x50] ss:$8 sps:$4 sm:$0xff]   ;;  %v1755_v20 = vld [vmem:[%s2589_s3 + $0xc4] ss:$8 sps:$4 sm:$0xff]  }
 0x114   :  { %v622_v57 = vpack.c.bf16 %v568_v53, %v567_v18  ;;  %v1729_v25 = vld [vmem:[%s2589_s3 + $0x10] ss:$8 sps:$4 sm:$0xff]   ;;  %v1761_v42 = vld [vmem:[%s2589_s3 + $0xe4] ss:$8 sps:$4 sm:$0xff]   ;;  %v1763_v32 = vld [vmem:[%s2589_s3 + $0xe0] ss:$8 sps:$4 sm:$0xff]  }
 0x115   :  { %v565_v4 = vmax.f32 %v487_v14, 0.0 }
 0x116   :  { %1538 = vmatpush3.bf16.msra.mxu0 %v619_v15  ;;  %1692 = vmatpush3.bf16.msra.mxu1 %v619_v15  ;;  %v2401_v15 = vpop.permute.xlu1 %678  ;;  %v2407_v41 = vpop.permute.xlu0 %693 }
 0x117   :  { %1539 = vmatprep.subr.bf16.mxu0 %v626_v52  ;;  %1685 = vmatprep.subr.bf16.mxu1 %v626_v52  ;;  %v621_v22 = vpack.c.bf16 %v566_v17, %v565_v4 }
 0x11a   :  { %1540 = vmatpush3.bf16.msra.mxu0 %v618_v49  ;;  %1693 = vmatpush3.bf16.msra.mxu1 %v618_v49  ;;  %v2405_v52 = vpop.permute.xlu1 %688  ;;  %v2411_v45 = vpop.permute.xlu0 %703 }
 0x11b   :  { %1541 = vmatprep.subr.bf16.mxu0 %v625_v16  ;;  %1686 = vmatprep.subr.bf16.mxu1 %v625_v16 }
 0x11e   :  { %1542 = vmatpush3.bf16.msra.mxu0 %v617_v11  ;;  %1694 = vmatpush3.bf16.msra.mxu1 %v617_v11  ;;  %v2409_v44 = vpop.permute.xlu1 %698  ;;  %v2415_v47 = vpop.permute.xlu0 %713 }
 0x11f   :  { %1543 = vmatprep.subr.bf16.mxu0 %v624_v29  ;;  %1687 = vmatprep.subr.bf16.mxu1 %v624_v29 }
 0x122   :  { %1544 = vmatpush3.bf16.msra.mxu0 %v2253_v8  ;;  %1695 = vmatpush3.bf16.msra.mxu1 %v2253_v8  ;;  %v1722_v8 = vld [vmem:[%s2589_s3] ss:$8 sps:$4 sm:$0xff]   ;;  %v2413_v5 = vpop.permute.xlu1 %708  ;;  %v2419_v38 = vpop.permute.xlu0 %723 }
 0x123   :  { %1545 = vmatprep.subr.bf16.mxu0 %v623_v30  ;;  %1688 = vmatprep.subr.bf16.mxu1 %v623_v30 }
 0x126   :  { %1546 = vmatpush3.bf16.msra.mxu0 %v2257_v12  ;;  %1696 = vmatpush3.bf16.msra.mxu1 %v2257_v12  ;;  %v1725_v12 = vld [vmem:[%s2589_s3 + $0x14] ss:$8 sps:$4 sm:$0xff]   ;;  %v2417_v49 = vpop.permute.xlu1 %718  ;;  %v2423_v56 = vpop.permute.xlu0 %733 }
 0x127   :  { %1547 = vmatprep.subr.bf16.mxu0 %v622_v57  ;;  %1689 = vmatprep.subr.bf16.mxu1 %v622_v57 }
 0x12a   :  { %1548 = vmatpush3.bf16.msra.mxu0 %v2249_v50  ;;  %1697 = vmatpush3.bf16.msra.mxu1 %v2249_v50  ;;  %v1727_v50 = vld [vmem:[%s2589_s3 + $0x64] ss:$8 sps:$4 sm:$0xff]   ;;  %v2421_v48 = vpop.permute.xlu1 %728  ;;  %v2427_v62 = vpop.permute.xlu0 %743 }
 0x12b   :  { %1549 = vmatprep.subr.bf16.mxu0 %v621_v22  ;;  %1690 = vmatprep.subr.bf16.mxu1 %v621_v22 }
 0x12e   :  { %1550 = vmatpush3.bf16.msra.mxu0 %v2251_v54  ;;  %1698 = vmatpush3.bf16.msra.mxu1 %v2251_v54  ;;  %v1730_v54 = vld [vmem:[%s2589_s3 + $0x60] ss:$8 sps:$4 sm:$0xff]   ;;  %v2425_v16 = vpop.permute.xlu1 %738  ;;  %v2431_v55 = vpop.permute.xlu0 %753 }
 0x131   :  { %1014 = vmatmul.mubr.bf16.vlgmr.msra.gmra.mxu0 %v1722_v8  ;;  %1054 = vmatmul.mubr.bf16.vlgmr.msra.gmra.mxu1 %v1719_v21 }
 0x132   :  { %1021 = vmatprep.mubr.bf16.mxu0 %v1725_v12  ;;  %1061 = vmatprep.mubr.bf16.mxu1 %v1727_v50  ;;  %v2429_v33 = vpop.permute.xlu1 %748  ;;  %v2435_v59 = vpop.permute.xlu0 %763 }
 0x133   :  { %2595 = vst [vmem:[#allocation7_spill] sm:$0xff] %v2435_v59 }
 0x136   :  { %v2433_v11 = vpop.permute.xlu1 %758  ;;  %v2439_v51 = vpop.permute.xlu0 %773 }
 0x137   :  { %2594 = vst [vmem:[#allocation6_spill] sm:$0xff] %v2433_v11  ;;  %2597 = vst [vmem:[#allocation9_spill] sm:$0xff] %v2439_v51 }
 0x139   :  { %1022 = vmatmul.mubr.bf16.gmra.mxu0 %v1729_v25  ;;  %1062 = vmatmul.mubr.bf16.gmra.mxu1 %v1730_v54 }
 0x13a   :  { %1029 = vmatprep.mubr.bf16.mxu0 %v1731_v26  ;;  %1069 = vmatprep.mubr.bf16.mxu1 %v1733_v58  ;;  %v2437_v29 = vpop.permute.xlu1 %768  ;;  %v2443_v34 = vpop.permute.xlu0 %783 }
 0x13b   :  { %2596 = vst [vmem:[#allocation8_spill] sm:$0xff] %v2437_v29  ;;  %2599 = vst [vmem:[#allocation11_spill] sm:$0xff] %v2443_v34 }
 0x13e   :  { %v2441_v10 = vpop.permute.xlu1 %778  ;;  %v2447_v7 = vpop.permute.xlu0 %793 }
 0x13f   :  { %2598 = vst [vmem:[#allocation10_spill] sm:$0xff] %v2441_v10  ;;  %2601 = vst [vmem:[#allocation13_spill] sm:$0xff] %v2447_v7 }
 0x141   :  { %1030 = vmatmul.mubr.bf16.gmra.mxu0 %v1735_v60  ;;  %1070 = vmatmul.mubr.bf16.gmra.mxu1 %v1736_v61 }
 0x142   :  { %1037 = vmatprep.mubr.bf16.mxu0 %v1737_v63  ;;  %1077 = vmatprep.mubr.bf16.mxu1 %v1739_v0  ;;  %v2445_v53 = vpop.permute.xlu1 %788  ;;  %v2451_v18 = vpop.permute.xlu0 %803 }
 0x143   :  { %2600 = vst [vmem:[#allocation12_spill] sm:$0xff] %v2445_v53  ;;  %2603 = vst [vmem:[#allocation15_spill] sm:$0xff] %v2451_v18 }
 0x146   :  { %v2449_v30 = vpop.permute.xlu1 %798  ;;  %v1214_v57 = vpop.permute.xlu0 %1213 }
 0x147   :  { %2602 = vst [vmem:[#allocation14_spill] sm:$0xff] %v2449_v30 }
 0x149   :  { %1038 = vmatmul.mubr.bf16.gmra.mxu0 %v1741_v2  ;;  %1078 = vmatmul.mubr.bf16.gmra.mxu1 %v1742_v3 }
 0x14a   :  { %1045 = vmatprep.mubr.bf16.mxu0 %v1743_v28  ;;  %1085 = vmatprep.mubr.bf16.mxu1 %v1745_v6  ;;  %v1209_v14 = vpop.permute.xlu1 %1208  ;;  %v2453_v4 = vpop.permute.xlu0 %1223 }
 0x14e   :  { %v1219_v17 = vpop.permute.xlu1 %1218  ;;  %v2461_v25 = vpop.permute.xlu0 %1233 }
 0x151   :  { %1046 = vmatmul.mubr.bf16.gmra.mxu0 %v1747_v23  ;;  %1086 = vmatmul.mubr.bf16.gmra.mxu1 %v1748_v24 }
 0x152   :  { %1093 = vmatprep.mubr.bf16.mxu1 %v1749_v9  ;;  %v2457_v8 = vpop.permute.xlu1 %1228  ;;  %v2471_v2 = vpop.permute.xlu0 %1243 }
 0x156   :  { %v2467_v61 = vpop.permute.xlu1 %1238 }
 0x159   :  { %1094 = vmatmul.mubr.bf16.gmra.mxu1 %v1751_v19 }
 0x15a   :  { %1101 = vmatprep.mubr.bf16.mxu1 %v1752_v31  ;;  %v2477_v24 = vpop.permute.xlu1 %1248  ;;  %v2481_v31 = vpop.permute.xlu0 %1253 }
 0x15e   :  { %v2491_v53 = vpop.permute.xlu0 %1263 }
 0x161   :  { %1102 = vmatmul.mubr.bf16.gmra.mxu1 %v1754_v27 }
 0x162   :  { %1109 = vmatprep.mubr.bf16.mxu1 %v1755_v20 }
 0x169   :  { %1110 = vmatmul.mubr.bf16.gmra.mxu1 %v1757_v43 }
 0x16a   :  { %1117 = vmatprep.mubr.bf16.mxu1 %v1758_v36 }
 0x171   :  { %1118 = vmatmul.mubr.bf16.gmra.mxu1 %v1760_v13 }
 0x172   :  { %1125 = vmatprep.mubr.bf16.mxu1 %v1761_v42 }
 0x179   :  { %1126 = vmatmul.mubr.bf16.gmra.mxu1 %v1763_v32 }
 0x17a   :  { %1133 = vmatprep.mubr.bf16.mxu1 %v1764_v40  ;;  %v2487_v40 = vpop.permute.xlu1 %1258 }
 0x181   :  { %1134 = vmatmul.mubr.bf16.gmra.mxu1 %v1766_v35 }
 0x1f1   :  { %v1551_v22 = vpop.f32.mrf.mxu0  ;;  %v2455_v21 = vpop.f32.mrf.mxu1 }
 0x1f3   :  { %v1552_v12 = vpop.f32.mrf.mxu0  ;;  %v2459_v50 = vpop.f32.mrf.mxu1 }
 0x1f4   :  { %v1553_v36 = vadd.f32 %v1552_v12, %v1551_v22 }
 0x1f5   :  { %v1554_v54 = vpop.f32.mrf.mxu0  ;;  %v2463_v26 = vpop.f32.mrf.mxu1 }
 0x1f6   :  { %v1016_v34 = vadd.f32 %v1553_v36, %v2397_v39 }
 0x1f7   :  { %v1555_v58 = vpop.f32.mrf.mxu0  ;;  %v2465_v60 = vpop.f32.mrf.mxu1 }
 0x1f8   :  { %v1556_v27 = vadd.f32 %v1555_v58, %v1554_v54 }
 0x1f9   :  { %v1557_v63 = vpop.f32.mrf.mxu0  ;;  %v2469_v0 = vpop.f32.mrf.mxu1 }
 0x1fa   :  { %v1019_v35 = vadd.f32 %v1556_v27, %v669_v1 }
 0x1fb   :  { %v1558_v3 = vpop.f32.mrf.mxu0  ;;  %v2473_v28 = vpop.f32.mrf.mxu1 }
 0x1fc   :  { %v1559_v13 = vadd.f32 %v1558_v3, %v1557_v63  ;;  %v1143_v12 = vmax.f32 %v1019_v35, 0.0 }
 0x1fd   :  { %v1560_v6 = vpop.f32.mrf.mxu0  ;;  %v2475_v23 = vpop.f32.mrf.mxu1 }
 0x1fe   :  { %v1024_v54 = vadd.f32 %v1559_v13, %v2399_v46  ;;  %v2505_v46 = vpop.permute.xlu0 %1273 }
 0x1ff   :  { %v1561_v9 = vpop.f32.mrf.mxu0  ;;  %v2479_v19 = vpop.f32.mrf.mxu1 }
 0x200   :  { %v1562_v18 = vadd.f32 %v1561_v9, %v1560_v6  ;;  %v2500_v6 = vpop.permute.xlu1 %1268  ;;  %v1142_v9 = vmax.f32 %v1016_v34, 0.0  ;;  %v1144_v27 = vmax.f32 %v1024_v54, 0.0 }
 0x201   :  { %v1563_v20 = vpop.f32.mrf.mxu0  ;;  %v2483_v43 = vpop.f32.mrf.mxu1 }
 0x202   :  { %v1027_v63 = vadd.f32 %v1562_v18, %v2401_v15  ;;  %v1366_v18 = vmul.f32 %v1209_v14, %v1142_v9  ;;  %v1368_v35 = vmul.f32 %v1219_v17, %v1144_v27  ;;  %v1583_v9 = vadd.f32 %v2459_v50, %v2455_v21 }
 0x203   :  { %v1564_v42 = vpop.f32.mrf.mxu0  ;;  %v2485_v32 = vpop.f32.mrf.mxu1  ;;  %v1589_v50 = vadd.f32 %v2473_v28, %v2469_v0 }
 0x204   :  { %v1565_v58 = vadd.f32 %v1564_v42, %v1563_v20  ;;  %v1367_v20 = vmul.f32 %v1214_v57, %v1143_v12  ;;  %v1145_v13 = vmax.f32 %v1027_v63, 0.0  ;;  %v1056_v21 = vadd.f32 %v1583_v9, %v2415_v47 }
 0x205   :  { %v1566_v30 = vpop.f32.mrf.mxu0  ;;  %v2489_v7 = vpop.f32.mrf.mxu1  ;;  %v1595_v28 = vadd.f32 %v2485_v32, %v2483_v43 }
 0x206   :  { %v1032_v29 = vadd.f32 %v1565_v58, %v2403_v37  ;;  %v2513_v58 = vpop.permute.xlu1 %1278  ;;  %v1398_v11 = vadd.f32 %v1367_v20, %v1366_v18  ;;  %v1369_v57 = vmul.f32 %v2453_v4, %v1145_v13 }
 0x207   :  { %v1567_v10 = vpop.f32.mrf.mxu0  ;;  %v2495_v22 = vpop.f32.mrf.mxu1  ;;  %v1072_v43 = vadd.f32 %v1595_v28, %v2423_v56 }
 0x208   :  { %v1568_v3 = vadd.f32 %v1567_v10, %v1566_v30  ;;  %v1146_v59 = vmax.f32 %v1032_v29, 0.0  ;;  %v1399_v14 = vadd.f32 %v1398_v11, %v1368_v35 }
 0x209   :  { %v1569_v51 = vpop.f32.mrf.mxu0  ;;  %v2498_v1 = vpop.f32.mrf.mxu1  ;;  %v1156_v56 = vmax.f32 %v1072_v43, 0.0 }
 0x20a   :  { %v1035_v42 = vadd.f32 %v1568_v3, %v2405_v52  ;;  %v2518_v3 = vpop.permute.xlu0 %1283  ;;  %v1370_v29 = vmul.f32 %v2457_v8, %v1146_v59  ;;  %v1400_v20 = vadd.f32 %v1399_v14, %v1369_v57  ;;  %v2527_v18 = vpop.permute.xlu1 %1288  ;;  %v1064_v14 = vadd.f32 %v1589_v50, %v2419_v38 }
 0x20b   :  { %v1570_v39 = vpop.f32.mrf.mxu0  ;;  %v2503_v36 = vpop.f32.mrf.mxu1 }
 0x20c   :  { %v1571_v15 = vadd.f32 %v1570_v39, %v1569_v51  ;;  %v1147_v12 = vmax.f32 %v1035_v42, 0.0  ;;  %v1401_v59 = vadd.f32 %v1400_v20, %v1370_v29  ;;  %v1154_v20 = vmax.f32 %v1064_v14, 0.0 }
 0x20d   :  { %v1572_v10 = vpop.f32.mrf.mxu0  ;;  %v2508_v30 = vpop.f32.mrf.mxu1 }
 0x20e   :  { %v1040_v34 = vadd.f32 %v1571_v15, %v2407_v41  ;;  %v1371_v4 = vmul.f32 %v2461_v25, %v1147_v12  ;;  %v1586_v15 = vadd.f32 %v2465_v60, %v2463_v26  ;;  %v2535_v57 = vpop.permute.xlu0 %1293 }
 0x20f   :  { %v1573_v54 = vpop.f32.mrf.mxu0  ;;  %v2511_v37 = vpop.f32.mrf.mxu1 }
 0x210   :  { %v1574_v63 = vadd.f32 %v1573_v54, %v1572_v10  ;;  %v1148_v17 = vmax.f32 %v1040_v34, 0.0  ;;  %v1402_v34 = vadd.f32 %v1401_v59, %v1371_v4  ;;  %v1059_v12 = vadd.f32 %v1586_v15, %v2417_v49 }
 0x211   :  { %v1575_v52 = vpop.f32.mrf.mxu0  ;;  %v2516_v51 = vpop.f32.mrf.mxu1  ;;  %v1601_v4 = vadd.f32 %v2503_v36, %v2498_v1 }
 0x212   :  { %v1043_v41 = vadd.f32 %v1574_v63, %v2409_v44  ;;  %v1372_v44 = vmul.f32 %v2467_v61, %v1148_v17  ;;  %v1153_v49 = vmax.f32 %v1059_v12, 0.0 }
 0x213   :  { %v1576_v27 = vpop.f32.mrf.mxu0  ;;  %v1606_v39 = vpop.f32.mrf.mxu1 }
 0x214   :  { %v1149_v13 = vmax.f32 %v1043_v41, 0.0  ;;  %v1577_v42 = vadd.f32 %v1576_v27, %v1575_v52  ;;  %v1403_v61 = vadd.f32 %v1402_v34, %v1372_v44  ;;  %v2545_v41 = vpop.permute.xlu1 %1298  ;;  %v1304_v27 = vpop.permute.xlu0 %1303  ;;  %v1080_v44 = vadd.f32 %v1601_v4, %v2427_v62 }
 0x215   :  { %v1578_v10 = vpop.f32.mrf.mxu0  ;;  %v1608_v11 = vpop.f32.mrf.mxu1  ;;  %v1607_v1 = vadd.f32 %v1606_v39, %v2516_v51  ;;  %v2604_v51 = vld [vmem:[#allocation6_spill] sm:$0xff] }
 0x216   :  { %v1048_v8 = vadd.f32 %v1577_v42, %v2411_v45  ;;  %v1373_v54 = vmul.f32 %v2471_v2, %v1149_v13  ;;  %v1592_v45 = vadd.f32 %v2479_v19, %v2475_v23  ;;  %v1152_v2 = vmax.f32 %v1056_v21, 0.0 }
 0x217   :  { %v1579_v25 = vpop.f32.mrf.mxu0  ;;  %v1609_v35 = vpop.f32.mrf.mxu1  ;;  %v1377_v42 = vmul.f32 %v2491_v53, %v1153_v49 }
 0x218   :  { %v1150_v26 = vmax.f32 %v1048_v8, 0.0  ;;  %v1580_v60 = vadd.f32 %v1579_v25, %v1578_v10  ;;  %v1404_v29 = vadd.f32 %v1403_v61, %v1373_v54  ;;  %v1067_v23 = vadd.f32 %v1592_v45, %v2421_v48  ;;  %v1309_v10 = vpop.permute.xlu1 %1308  ;;  %v1314_v8 = vpop.permute.xlu0 %1313 }
 0x219   :  { %v1611_v63 = vpop.f32.mrf.mxu1  ;;  %v1376_v38 = vmul.f32 %v2487_v40, %v1152_v2  ;;  %v1378_v40 = vmul.f32 %v2500_v6, %v1154_v20  ;;  %v1610_v53 = vadd.f32 %v1609_v35, %v1608_v11  ;;  %v1158_v54 = vmax.f32 %v1080_v44, 0.0  ;;  %v2605_v2 = vld [vmem:[#allocation7_spill] sm:$0xff] }
 0x21a   :  { %v1374_v47 = vmul.f32 %v2477_v24, %v1150_v26  ;;  %v1051_v0 = vadd.f32 %v1580_v60, %v2413_v5  ;;  %v1598_v24 = vadd.f32 %v2495_v22, %v2489_v7  ;;  %v1155_v15 = vmax.f32 %v1067_v23, 0.0 }
 0x21b   :  { %v1612_v52 = vpop.f32.mrf.mxu1  ;;  %v1088_v6 = vadd.f32 %v1607_v1, %v2431_v55  ;;  %v1091_v39 = vadd.f32 %v1610_v53, %v2604_v51 }
 0x21c   :  { %v1151_v17 = vmax.f32 %v1051_v0, 0.0  ;;  %v1405_v19 = vadd.f32 %v1404_v29, %v1374_v47  ;;  %v1075_v7 = vadd.f32 %v1598_v24, %v2425_v16  ;;  %v1379_v50 = vmul.f32 %v2505_v46, %v1155_v15  ;;  %v1319_v60 = vpop.permute.xlu1 %1318  ;;  %v1324_v61 = vpop.permute.xlu0 %1323  ;;  %v2607_v24 = vld [vmem:[#allocation9_spill] sm:$0xff] }
 0x21d   :  { %v1614_v9 = vpop.f32.mrf.mxu1  ;;  %v1613_v62 = vadd.f32 %v1612_v52, %v1611_v63  ;;  %v1160_v0 = vmax.f32 %v1088_v6, 0.0  ;;  %v1161_v14 = vmax.f32 %v1091_v39, 0.0 }
 0x21e   :  { %v1375_v5 = vmul.f32 %v2481_v31, %v1151_v17  ;;  %v1604_v31 = vadd.f32 %v2511_v37, %v2508_v30  ;;  %v1157_v16 = vmax.f32 %v1075_v7, 0.0  ;;  %v1380_v37 = vmul.f32 %v2513_v58, %v1156_v56  ;;  %v2606_v17 = vld [vmem:[#allocation8_spill] sm:$0xff] }
 0x21f   :  { %v1615_v32 = vpop.f32.mrf.mxu1  ;;  %v1382_v58 = vmul.f32 %v2527_v18, %v1158_v54  ;;  %v1096_v55 = vadd.f32 %v1613_v62, %v2605_v2  ;;  %v1385_v20 = vmul.f32 %v1304_v27, %v1161_v14  ;;  %v2611_v54 = vld [vmem:[#allocation13_spill] sm:$0xff] }
 0x220   :  { %v1406_v13 = vadd.f32 %v1405_v19, %v1375_v5  ;;  %v1083_v25 = vadd.f32 %v1604_v31, %v2429_v33  ;;  %v1381_v11 = vmul.f32 %v2518_v3, %v1157_v16  ;;  %v1616_v45 = vadd.f32 %v1615_v32, %v1614_v9  ;;  %v1329_v23 = vpop.permute.xlu1 %1328 }
 0x221   :  { %v1617_v48 = vpop.f32.mrf.mxu1  ;;  %v1384_v5 = vmul.f32 %v2545_v41, %v1160_v0  ;;  %v1162_v18 = vmax.f32 %v1096_v55, 0.0  ;;  %v2613_v55 = vld [vmem:[#allocation15_spill] sm:$0xff] }
 0x222   :  { %v1407_v22 = vadd.f32 %v1406_v13, %v1376_v38  ;;  %v1159_v35 = vmax.f32 %v1083_v25, 0.0  ;;  %v1099_v49 = vadd.f32 %v1616_v45, %v2606_v17  ;;  %v1334_v38 = vpop.permute.xlu0 %1333 }
 0x223   :  { %v1618_v59 = vpop.f32.mrf.mxu1  ;;  %v1386_v56 = vmul.f32 %v1309_v10, %v1162_v18 }
 0x224   :  { %v1408_v36 = vadd.f32 %v1407_v22, %v1377_v42  ;;  %v1619_v33 = vadd.f32 %v1618_v59, %v1617_v48  ;;  %v1383_v52 = vmul.f32 %v2535_v57, %v1159_v35  ;;  %v1163_v42 = vmax.f32 %v1099_v49, 0.0  ;;  %v2608_v48 = vld [vmem:[#allocation10_spill] sm:$0xff]  ;;  %v2609_v59 = vld [vmem:[#allocation11_spill] sm:$0xff]  ;;  %v1339_v1 = vpop.permute.xlu1 %1338 }
 0x225   :  { %v1620_v21 = vpop.f32.mrf.mxu1 }
 0x226   :  { %v1409_v30 = vadd.f32 %v1408_v36, %v1378_v40  ;;  %v1104_v9 = vadd.f32 %v1619_v33, %v2607_v24  ;;  %v1387_v53 = vmul.f32 %v1314_v8, %v1163_v42  ;;  %v809_v16 = vpop.permute.xlu0 %808 }
 0x227   :  { %v1621_v34 = vpop.f32.mrf.mxu1 }
 0x228   :  { %v1410_v26 = vadd.f32 %v1409_v30, %v1379_v50  ;;  %v1622_v3 = vadd.f32 %v1621_v34, %v1620_v21  ;;  %v1164_v7 = vmax.f32 %v1104_v9, 0.0  ;;  %v2610_v50 = vld [vmem:[#allocation12_spill] sm:$0xff]  ;;  %v1344_v35 = vpop.permute.xlu1 %1343 }
 0x229   :  { %v1623_v12 = vpop.f32.mrf.mxu1 }
 0x22a   :  { %v1411_v46 = vadd.f32 %v1410_v26, %v1380_v37  ;;  %v1107_v57 = vadd.f32 %v1622_v3, %v2608_v48  ;;  %v1388_v25 = vmul.f32 %v1319_v60, %v1164_v7 }
 0x22b   :  { %v1624_v47 = vpop.f32.mrf.mxu1 }
 0x22c   :  { %v1412_v28 = vadd.f32 %v1411_v46, %v1381_v11  ;;  %v1625_v32 = vadd.f32 %v1624_v47, %v1623_v12  ;;  %v1165_v21 = vmax.f32 %v1107_v57, 0.0  ;;  %v2612_v12 = vld [vmem:[#allocation14_spill] sm:$0xff]  ;;  %v1349_v17 = vpop.permute.xlu1 %1348 }
 0x22d   :  { %v1626_v63 = vpop.f32.mrf.mxu1 }
 0x22e   :  { %v1413_v29 = vadd.f32 %v1412_v28, %v1382_v58  ;;  %v1112_v40 = vadd.f32 %v1625_v32, %v2609_v59  ;;  %v1389_v51 = vmul.f32 %v1324_v61, %v1165_v21  ;;  %v814_v58 = vpop.permute.xlu0 %813 }
 0x22f   :  { %v1627_v19 = vpop.f32.mrf.mxu1 }
 0x230   :  { %v1414_v43 = vadd.f32 %v1413_v29, %v1383_v52  ;;  %v1628_v15 = vadd.f32 %v1627_v19, %v1626_v63  ;;  %v1166_v34 = vmax.f32 %v1112_v40, 0.0 }
 0x231   :  { %v1629_v4 = vpop.f32.mrf.mxu1 }
 0x232   :  { %v1415_v13 = vadd.f32 %v1414_v43, %v1384_v5  ;;  %v1115_v27 = vadd.f32 %v1628_v15, %v2610_v50  ;;  %v1390_v45 = vmul.f32 %v1329_v23, %v1166_v34  ;;  %v819_v23 = vpop.permute.xlu0 %818 }
 0x233   :  { %v1630_v31 = vpop.f32.mrf.mxu1 }
 0x234   :  { %v1416_v22 = vadd.f32 %v1415_v13, %v1385_v20  ;;  %v1631_v44 = vadd.f32 %v1630_v31, %v1629_v4  ;;  %v1167_v39 = vmax.f32 %v1115_v27, 0.0  ;;  %v1354_v13 = vpop.permute.xlu1 %1353 }
 0x235   :  { %v1632_v41 = vpop.f32.mrf.mxu1 }
 0x236   :  { %v1417_v36 = vadd.f32 %v1416_v22, %v1386_v56  ;;  %v1120_v6 = vadd.f32 %v1631_v44, %v2611_v54  ;;  %v1391_v28 = vmul.f32 %v1334_v38, %v1167_v39  ;;  %v1359_v31 = vpop.permute.xlu0 %1358 }
 0x237   :  { %v1633_v30 = vpop.f32.mrf.mxu1 }
 0x238   :  { %v1418_v37 = vadd.f32 %v1417_v36, %v1387_v53  ;;  %v1634_v26 = vadd.f32 %v1633_v30, %v1632_v41  ;;  %v1168_v33 = vmax.f32 %v1120_v6, 0.0  ;;  %v1364_v44 = vpop.permute.xlu1 %1363 }
 0x239   :  { %v1635_v62 = vpop.f32.mrf.mxu1 }
 0x23a   :  { %v1419_v10 = vadd.f32 %v1418_v37, %v1388_v25  ;;  %v1123_v11 = vadd.f32 %v1634_v26, %v2612_v12  ;;  %v1392_v29 = vmul.f32 %v1339_v1, %v1168_v33  ;;  %v1436_v25 = vstv %s2592_s6 }
 0x23b   :  { %v1636_v46 = vpop.f32.mrf.mxu1 }
 0x23c   :  { %v1420_v8 = vadd.f32 %v1419_v10, %v1389_v51  ;;  %v1637_v47 = vadd.f32 %v1636_v46, %v1635_v62  ;;  %v1169_v2 = vmax.f32 %v1123_v11, 0.0 }
 0x23d   :  { %v1638_v60 = vpop.f32.mrf.mxu1 }
 0x23e   :  { %v1421_v0 = vadd.f32 %v1420_v8, %v1390_v45  ;;  %v1128_v14 = vadd.f32 %v1637_v47, %v2613_v55  ;;  %v1393_v24 = vmul.f32 %v1344_v35, %v1169_v2 }
 0x23f   :  { %v1639_v63 = vpop.f32.mrf.mxu1 }
 0x240   :  { %v1422_v52 = vadd.f32 %v1421_v0, %v1391_v28  ;;  %v1640_v61 = vadd.f32 %v1639_v63, %v1638_v60  ;;  %v1170_v9 = vmax.f32 %v1128_v14, 0.0 }
 0x241   :  { %v1641_v49 = vpop.f32.mrf.mxu1 }
 0x242   :  { %v1423_v3 = vadd.f32 %v1422_v52, %v1392_v29  ;;  %v1131_v19 = vadd.f32 %v1640_v61, %v809_v16  ;;  %v1394_v38 = vmul.f32 %v1349_v17, %v1170_v9 }
 0x243   :  { %v1642_v5 = vpop.f32.mrf.mxu1 }
 0x244   :  { %v1424_v43 = vadd.f32 %v1423_v3, %v1393_v24  ;;  %v1171_v18 = vmax.f32 %v1131_v19, 0.0  ;;  %v1643_v32 = vadd.f32 %v1642_v5, %v1641_v49 }
 0x245   :  { %v1644_v20 = vpop.f32.mrf.mxu1 }
 0x246   :  { %v1136_v4 = vadd.f32 %v1643_v32, %v814_v58  ;;  %v1425_v48 = vadd.f32 %v1424_v43, %v1394_v38  ;;  %v1395_v57 = vmul.f32 %v1354_v13, %v1171_v18 }
 0x247   :  { %v1645_v42 = vpop.f32.mrf.mxu1 }
 0x248   :  { %v1172_v15 = vmax.f32 %v1136_v4, 0.0  ;;  %v1646_v7 = vadd.f32 %v1645_v42, %v1644_v20  ;;  %v1426_v59 = vadd.f32 %v1425_v48, %v1395_v57 }
 0x24a   :  { %v1396_v22 = vmul.f32 %v1359_v31, %v1172_v15  ;;  %v1139_v56 = vadd.f32 %v1646_v7, %v819_v23 }
 0x24c   :  { %v1173_v40 = vmax.f32 %v1139_v56, 0.0  ;;  %v1427_v1 = vadd.f32 %v1426_v59, %v1396_v22 }
 0x24e   :  { %v1397_v41 = vmul.f32 %v1364_v44, %v1173_v40 }
 0x250   :  { %v1428_v36 = vadd.f32 %v1427_v1, %v1397_v41 }
 0x252   :  { %v1429_v53 = vrot.slane %v1428_v36, 4 }
 0x254   :  { %v1430_v21 = vadd.f32 %v1429_v53, %v1428_v36 }
 0x256   :  { %v1431_v50 = vrot.slane %v1430_v21, 2 }
 0x258   :  { %v1432_v27 = vadd.f32 %v1431_v50, %v1430_v21 }
 0x25a   :  { %v1433_v16 = vrot.slane %v1432_v27, 1 }
 0x25c   :  { %v1434_v30 = vadd.f32 %v1433_v16, %v1432_v27 }
 0x25e   :  { %v1437_v37 = vadd.f32 %v1436_v25, %v1434_v30 }
 0x260   :  { %1438 = vst [vmem:[#allocation3] sm:$0x1] %v1437_v37 }
 0x261   :  { %1778 = shalt.err (!%p1775_p4)
}
 0x262   :  { %1448 = dma.vmem_to_hbm [thread:$0]  %s1446_s14, 16, %s2593_s7, [#allocation4]  }
 0x263   :  { %1787 = dma.done.wait [#allocation4], 16  }
 0x264   :  { %1788 = vsyncadd [#allocation4], 4294967280 }
 0x265   :  { %1452 = vsyncpa [#allocation4], 1 }

</bundles_post_ra>
